<compile_context>
chip_gen: v7x
topology: tpu7x:2x2x1
jax: 0.10.0
libtpu: 0.0.40
codegen_flags: <defaults>
</compile_context>

<pallas_src>
import jax
import jax.numpy as jnp
from jax.experimental import pallas as pl

# ----------------------------- model config ---------------------------------
NTOKEN = 32
NEMBED = 32
NHIDDEN = 32
NLAYERS = 2
SEQ_LEN = 8
BATCH = 2


# --------------------------- fused forward kernel ---------------------------
def _lstm_unrolled(gx, whh, h, c, T, B, H):
    """Fully-unrolled LSTM recurrence.

    gx:  (T*B, 4H) precomputed x @ W_ih + b (input projection hoisted out).
    whh: (H, 4H) recurrent weight (already loaded as a value).
    h,c: (B, H) initial states, carried in vregs across the unrolled steps.
    Returns (y, h_T, c_T) with y of shape (T*B, H).
    """
    ys = []
    for t in range(T):                                   # static unroll (T=8)
        gates = gx[t * B:(t + 1) * B, :] + jnp.dot(
            h, whh, preferred_element_type=jnp.float32)  # (B, 4H)
        i_g = jax.nn.sigmoid(gates[:, 0 * H:1 * H])
        f_g = jax.nn.sigmoid(gates[:, 1 * H:2 * H])
        g_g = jnp.tanh(gates[:, 2 * H:3 * H])
        o_g = jax.nn.sigmoid(gates[:, 3 * H:4 * H])
        c = f_g * c + i_g * g_g
        h = o_g * jnp.tanh(c)
        ys.append(h)
    return jnp.concatenate(ys, axis=0), h, c


def make_fused_kernel(nlayers, T, B, H):
    def kernel(*refs):
        # inputs: emb, (w_ih, w_hh, b) * nlayers, h0, c0, w_dec, b_dec
        emb_ref = refs[0]
        layer_refs = refs[1:1 + 3 * nlayers]
        h0_ref, c0_ref, wdec_ref, bdec_ref = refs[1 + 3 * nlayers:5 + 3 * nlayers]
        # outputs
        logp_ref, hT_ref, cT_ref = refs[5 + 3 * nlayers:]

        x = emb_ref[...]                                   # (T*B, E)
        for l in range(nlayers):
            wih = layer_refs[3 * l][...]                   # (E|H, 4H)
            whh = layer_refs[3 * l + 1][...]               # (H, 4H)
            b = layer_refs[3 * l + 2][...]                 # (1, 4H)
            # Hoisted input projection: one (T*B, K) @ (K, 4H) MXU matmul.
            gx = jnp.dot(x, wih, preferred_element_type=jnp.float32) + b
            x, h_last, c_last = _lstm_unrolled(gx, whh, h0_ref[l], c0_ref[l],
                                               T, B, H)
            hT_ref[l] = h_last                             # single store/layer
            cT_ref[l] = c_last
            # TODO(synk): inter-layer dropout skipped (eval-mode identity).

        # ---- decoder + log_softmax, written once ----
        logits = jnp.dot(x, wdec_ref[...],
                         preferred_element_type=jnp.float32) + bdec_ref[...]
        m = jnp.max(logits, axis=-1, keepdims=True)
        z = logits - m
        lse = jnp.log(jnp.sum(jnp.exp(z), axis=-1, keepdims=True))
        logp_ref[...] = z - lse

    return kernel


# ------------------------------ full forward --------------------------------
@jax.jit
def rnn_model_forward(params, tokens, hidden):
    T, B = tokens.shape
    H, V = NHIDDEN, NTOKEN
    # Embedding lookup (gather) — plain-JAX glue outside the kernel.
    emb = jnp.take(params["embedding"], tokens.reshape(-1), axis=0)  # (T*B, E)
    # TODO(synk): dropout on emb / output skipped (eval-mode identity).
    h0, c0 = hidden

    kernel = make_fused_kernel(NLAYERS, T, B, H)
    layer_args = []
    for l in range(NLAYERS):
        layer_args += [params["w_ih"][l], params["w_hh"][l], params["b"][l]]

    log_probs, hT, cT = pl.pallas_call(
        kernel,
        out_shape=(
            jax.ShapeDtypeStruct((T * B, V), jnp.float32),
            jax.ShapeDtypeStruct((NLAYERS, B, H), jnp.float32),
            jax.ShapeDtypeStruct((NLAYERS, B, H), jnp.float32),
        ),
    )(emb, *layer_args, h0, c0, params["w_dec"], params["b_dec"].reshape(1, V))

    return log_probs, (hT, cT)


# --------------------------- deterministic params ---------------------------
def init_params(key):
    keys = jax.random.split(key, 4 + 4 * NLAYERS)
    k_stdev = 1.0 / jnp.sqrt(NHIDDEN)

    params = {
        # nn.Embedding weight ~ U(-0.1, 0.1)
        "embedding": jax.random.uniform(keys[0], (NTOKEN, NEMBED),
                                        jnp.float32, -0.1, 0.1),
        # decoder: nn.Linear(nhidden, ntoken); weight ~ U(-0.1, 0.1)
        "w_dec": jax.random.uniform(keys[1], (NHIDDEN, NTOKEN),
                                    jnp.float32, -0.1, 0.1),
        "b_dec": jax.random.uniform(keys[2], (NTOKEN,),
                                    jnp.float32, -k_stdev, k_stdev),
        "w_ih": [],
        "w_hh": [],
        "b": [],
    }
    for layer in range(NLAYERS):
        kw = jax.random.split(keys[4 + layer], 4)
        in_dim = NEMBED if layer == 0 else NHIDDEN
        # PyTorch LSTM weights ~ U(-1/sqrt(H), 1/sqrt(H)); stored transposed.
        w_ih = jax.random.uniform(kw[0], (in_dim, 4 * NHIDDEN),
                                  jnp.float32, -k_stdev, k_stdev)
        w_hh = jax.random.uniform(kw[1], (NHIDDEN, 4 * NHIDDEN),
                                  jnp.float32, -k_stdev, k_stdev)
        b_ih = jax.random.uniform(kw[2], (4 * NHIDDEN,),
                                  jnp.float32, -k_stdev, k_stdev)
        b_hh = jax.random.uniform(kw[3], (4 * NHIDDEN,),
                                  jnp.float32, -k_stdev, k_stdev)
        params["w_ih"].append(w_ih)
        params["w_hh"].append(w_hh)
        params["b"].append((b_ih + b_hh).reshape(1, 4 * NHIDDEN))
    return params


def init_hidden(bsz):
    zeros = jnp.zeros((NLAYERS, bsz, NHIDDEN), jnp.float32)
    return (zeros, zeros)


# ----------------------------------- main ------------------------------------
if __name__ == "__main__":
    root = jax.random.PRNGKey(0)
    k_params, k_tokens = jax.random.split(root)

    params = init_params(k_params)
    tokens = jax.random.randint(k_tokens, (SEQ_LEN, BATCH), 0, NTOKEN,
                                dtype=jnp.int32)
    hidden = init_hidden(BATCH)

    log_probs, (hT, cT) = rnn_model_forward(params, tokens, hidden)
    jax.block_until_ready((log_probs, hT, cT))

    assert log_probs.shape == (SEQ_LEN * BATCH, NTOKEN)
    assert hT.shape == (NLAYERS, BATCH, NHIDDEN)
    assert cT.shape == (NLAYERS, BATCH, NHIDDEN)
    # log_softmax rows should sum (in prob space) to ~1.
    row_sums = jnp.sum(jnp.exp(log_probs), axis=-1)
    assert jnp.allclose(row_sums, 1.0, atol=1e-4)
    assert bool(jnp.all(jnp.isfinite(log_probs)))

    print("KERNEL_OK")
</pallas_src>

<mosaic_0001>
module attributes {stable_mosaic.version = 11 : i64} {
  func.func @kernel(%arg0: memref<16x32xf32, #tpu.memory_space<vmem>>, %arg1: memref<32x128xf32, #tpu.memory_space<vmem>>, %arg2: memref<32x128xf32, #tpu.memory_space<vmem>>, %arg3: memref<1x128xf32, #tpu.memory_space<vmem>>, %arg4: memref<32x128xf32, #tpu.memory_space<vmem>>, %arg5: memref<32x128xf32, #tpu.memory_space<vmem>>, %arg6: memref<1x128xf32, #tpu.memory_space<vmem>>, %arg7: memref<2x2x32xf32, #tpu.memory_space<vmem>>, %arg8: memref<2x2x32xf32, #tpu.memory_space<vmem>>, %arg9: memref<32x32xf32, #tpu.memory_space<vmem>>, %arg10: memref<1x32xf32, #tpu.memory_space<vmem>>, %arg11: memref<16x32xf32, #tpu.memory_space<vmem>>, %arg12: memref<2x2x32xf32, #tpu.memory_space<vmem>>, %arg13: memref<2x2x32xf32, #tpu.memory_space<vmem>>) attributes {dimension_semantics = [], scalar_prefetch = 0 : i64, scratch_operands = 0 : i64, tpu.core_type = #tpu.core_type<tc>} {
    %c0 = arith.constant 0 : index
    %c0_0 = arith.constant 0 : index
    %0 = vector.load %arg0[%c0, %c0_0] : memref<16x32xf32, #tpu.memory_space<vmem>>, vector<16x32xf32>
    %c0_1 = arith.constant 0 : index
    %c0_2 = arith.constant 0 : index
    %1 = vector.load %arg1[%c0_1, %c0_2] : memref<32x128xf32, #tpu.memory_space<vmem>>, vector<32x128xf32>
    %c0_3 = arith.constant 0 : index
    %c0_4 = arith.constant 0 : index
    %2 = vector.load %arg2[%c0_3, %c0_4] : memref<32x128xf32, #tpu.memory_space<vmem>>, vector<32x128xf32>
    %c0_5 = arith.constant 0 : index
    %c0_6 = arith.constant 0 : index
    %3 = vector.load %arg3[%c0_5, %c0_6] : memref<1x128xf32, #tpu.memory_space<vmem>>, vector<1x128xf32>
    %cst = arith.constant dense<0.000000e+00> : vector<16x128xf32>
    %4 = tpu.matmul %0, %1, %cst {dimension_numbers = #tpu.dot_dimension_numbers<[1], [0], [0], [1], [0, 0, 1, 1], [], []>} : vector<16x32xf32>, vector<32x128xf32>, vector<16x128xf32> -> vector<16x128xf32>
    %5 = vector.broadcast %3 : vector<1x128xf32> to vector<16x128xf32>
    %6 = arith.addf %4, %5 : vector<16x128xf32>
    %c0_7 = arith.constant 0 : index
    %c0_8 = arith.constant 0 : index
    %c0_9 = arith.constant 0 : index
    %7 = vector.load %arg7[%c0_7, %c0_8, %c0_9] : memref<2x2x32xf32, #tpu.memory_space<vmem>>, vector<1x2x32xf32>
    %8 = vector.shape_cast %7 : vector<1x2x32xf32> to vector<2x32xf32>
    %c0_10 = arith.constant 0 : index
    %c0_11 = arith.constant 0 : index
    %c0_12 = arith.constant 0 : index
    %9 = vector.load %arg8[%c0_10, %c0_11, %c0_12] : memref<2x2x32xf32, #tpu.memory_space<vmem>>, vector<1x2x32xf32>
    %10 = vector.shape_cast %9 : vector<1x2x32xf32> to vector<2x32xf32>
    %11 = vector.extract_strided_slice %6 {offsets = [0, 0], sizes = [2, 128], strides = [1, 1]} : vector<16x128xf32> to vector<2x128xf32>
    %cst_13 = arith.constant dense<0.000000e+00> : vector<2x128xf32>
    %12 = tpu.matmul %8, %2, %cst_13 {dimension_numbers = #tpu.dot_dimension_numbers<[1], [0], [0], [1], [0, 0, 1, 1], [], []>} : vector<2x32xf32>, vector<32x128xf32>, vector<2x128xf32> -> vector<2x128xf32>
    %13 = arith.addf %11, %12 : vector<2x128xf32>
    %14 = vector.extract_strided_slice %13 {offsets = [0, 0], sizes = [2, 32], strides = [1, 1]} : vector<2x128xf32> to vector<2x32xf32>
    %15 = arith.negf %14 : vector<2x32xf32>
    %16 = math.exp %15 : vector<2x32xf32>
    %cst_14 = arith.constant 1.000000e+00 : f32
    %17 = vector.broadcast %cst_14 : f32 to vector<2x32xf32>
    %18 = arith.addf %17, %16 : vector<2x32xf32>
    %19 = arith.divf %17, %18 : vector<2x32xf32>
    %20 = vector.extract_strided_slice %13 {offsets = [0, 32], sizes = [2, 32], strides = [1, 1]} : vector<2x128xf32> to vector<2x32xf32>
    %21 = arith.negf %20 : vector<2x32xf32>
    %22 = math.exp %21 : vector<2x32xf32>
    %cst_15 = arith.constant 1.000000e+00 : f32
    %23 = vector.broadcast %cst_15 : f32 to vector<2x32xf32>
    %24 = arith.addf %23, %22 : vector<2x32xf32>
    %25 = arith.divf %23, %24 : vector<2x32xf32>
    %26 = vector.extract_strided_slice %13 {offsets = [0, 64], sizes = [2, 32], strides = [1, 1]} : vector<2x128xf32> to vector<2x32xf32>
    %27 = math.tanh %26 : vector<2x32xf32>
    %28 = vector.extract_strided_slice %13 {offsets = [0, 96], sizes = [2, 32], strides = [1, 1]} : vector<2x128xf32> to vector<2x32xf32>
    %29 = arith.negf %28 : vector<2x32xf32>
    %30 = math.exp %29 : vector<2x32xf32>
    %cst_16 = arith.constant 1.000000e+00 : f32
    %31 = vector.broadcast %cst_16 : f32 to vector<2x32xf32>
    %32 = arith.addf %31, %30 : vector<2x32xf32>
    %33 = arith.divf %31, %32 : vector<2x32xf32>
    %34 = arith.mulf %25, %10 : vector<2x32xf32>
    %35 = arith.mulf %19, %27 : vector<2x32xf32>
    %36 = arith.addf %34, %35 : vector<2x32xf32>
    %37 = math.tanh %36 : vector<2x32xf32>
    %38 = arith.mulf %33, %37 : vector<2x32xf32>
    %39 = vector.extract_strided_slice %6 {offsets = [2, 0], sizes = [2, 128], strides = [1, 1]} : vector<16x128xf32> to vector<2x128xf32>
    %cst_17 = arith.constant dense<0.000000e+00> : vector<2x128xf32>
    %40 = tpu.matmul %38, %2, %cst_17 {dimension_numbers = #tpu.dot_dimension_numbers<[1], [0], [0], [1], [0, 0, 1, 1], [], []>} : vector<2x32xf32>, vector<32x128xf32>, vector<2x128xf32> -> vector<2x128xf32>
    %41 = arith.addf %39, %40 : vector<2x128xf32>
    %42 = vector.extract_strided_slice %41 {offsets = [0, 0], sizes = [2, 32], strides = [1, 1]} : vector<2x128xf32> to vector<2x32xf32>
    %43 = arith.negf %42 : vector<2x32xf32>
    %44 = math.exp %43 : vector<2x32xf32>
    %cst_18 = arith.constant 1.000000e+00 : f32
    %45 = vector.broadcast %cst_18 : f32 to vector<2x32xf32>
    %46 = arith.addf %45, %44 : vector<2x32xf32>
    %47 = arith.divf %45, %46 : vector<2x32xf32>
    %48 = vector.extract_strided_slice %41 {offsets = [0, 32], sizes = [2, 32], strides = [1, 1]} : vector<2x128xf32> to vector<2x32xf32>
    %49 = arith.negf %48 : vector<2x32xf32>
    %50 = math.exp %49 : vector<2x32xf32>
    %cst_19 = arith.constant 1.000000e+00 : f32
    %51 = vector.broadcast %cst_19 : f32 to vector<2x32xf32>
    %52 = arith.addf %51, %50 : vector<2x32xf32>
    %53 = arith.divf %51, %52 : vector<2x32xf32>
    %54 = vector.extract_strided_slice %41 {offsets = [0, 64], sizes = [2, 32], strides = [1, 1]} : vector<2x128xf32> to vector<2x32xf32>
    %55 = math.tanh %54 : vector<2x32xf32>
    %56 = vector.extract_strided_slice %41 {offsets = [0, 96], sizes = [2, 32], strides = [1, 1]} : vector<2x128xf32> to vector<2x32xf32>
    %57 = arith.negf %56 : vector<2x32xf32>
    %58 = math.exp %57 : vector<2x32xf32>
    %cst_20 = arith.constant 1.000000e+00 : f32
    %59 = vector.broadcast %cst_20 : f32 to vector<2x32xf32>
    %60 = arith.addf %59, %58 : vector<2x32xf32>
    %61 = arith.divf %59, %60 : vector<2x32xf32>
    %62 = arith.mulf %53, %36 : vector<2x32xf32>
    %63 = arith.mulf %47, %55 : vector<2x32xf32>
    %64 = arith.addf %62, %63 : vector<2x32xf32>
    %65 = math.tanh %64 : vector<2x32xf32>
    %66 = arith.mulf %61, %65 : vector<2x32xf32>
    %67 = vector.extract_strided_slice %6 {offsets = [4, 0], sizes = [2, 128], strides = [1, 1]} : vector<16x128xf32> to vector<2x128xf32>
    %cst_21 = arith.constant dense<0.000000e+00> : vector<2x128xf32>
    %68 = tpu.matmul %66, %2, %cst_21 {dimension_numbers = #tpu.dot_dimension_numbers<[1], [0], [0], [1], [0, 0, 1, 1], [], []>} : vector<2x32xf32>, vector<32x128xf32>, vector<2x128xf32> -> vector<2x128xf32>
    %69 = arith.addf %67, %68 : vector<2x128xf32>
    %70 = vector.extract_strided_slice %69 {offsets = [0, 0], sizes = [2, 32], strides = [1, 1]} : vector<2x128xf32> to vector<2x32xf32>
    %71 = arith.negf %70 : vector<2x32xf32>
    %72 = math.exp %71 : vector<2x32xf32>
    %cst_22 = arith.constant 1.000000e+00 : f32
    %73 = vector.broadcast %cst_22 : f32 to vector<2x32xf32>
    %74 = arith.addf %73, %72 : vector<2x32xf32>
    %75 = arith.divf %73, %74 : vector<2x32xf32>
    %76 = vector.extract_strided_slice %69 {offsets = [0, 32], sizes = [2, 32], strides = [1, 1]} : vector<2x128xf32> to vector<2x32xf32>
    %77 = arith.negf %76 : vector<2x32xf32>
    %78 = math.exp %77 : vector<2x32xf32>
    %cst_23 = arith.constant 1.000000e+00 : f32
    %79 = vector.broadcast %cst_23 : f32 to vector<2x32xf32>
    %80 = arith.addf %79, %78 : vector<2x32xf32>
    %81 = arith.divf %79, %80 : vector<2x32xf32>
    %82 = vector.extract_strided_slice %69 {offsets = [0, 64], sizes = [2, 32], strides = [1, 1]} : vector<2x128xf32> to vector<2x32xf32>
    %83 = math.tanh %82 : vector<2x32xf32>
    %84 = vector.extract_strided_slice %69 {offsets = [0, 96], sizes = [2, 32], strides = [1, 1]} : vector<2x128xf32> to vector<2x32xf32>
    %85 = arith.negf %84 : vector<2x32xf32>
    %86 = math.exp %85 : vector<2x32xf32>
    %cst_24 = arith.constant 1.000000e+00 : f32
    %87 = vector.broadcast %cst_24 : f32 to vector<2x32xf32>
    %88 = arith.addf %87, %86 : vector<2x32xf32>
    %89 = arith.divf %87, %88 : vector<2x32xf32>
    %90 = arith.mulf %81, %64 : vector<2x32xf32>
    %91 = arith.mulf %75, %83 : vector<2x32xf32>
    %92 = arith.addf %90, %91 : vector<2x32xf32>
    %93 = math.tanh %92 : vector<2x32xf32>
    %94 = arith.mulf %89, %93 : vector<2x32xf32>
    %95 = vector.extract_strided_slice %6 {offsets = [6, 0], sizes = [2, 128], strides = [1, 1]} : vector<16x128xf32> to vector<2x128xf32>
    %cst_25 = arith.constant dense<0.000000e+00> : vector<2x128xf32>
    %96 = tpu.matmul %94, %2, %cst_25 {dimension_numbers = #tpu.dot_dimension_numbers<[1], [0], [0], [1], [0, 0, 1, 1], [], []>} : vector<2x32xf32>, vector<32x128xf32>, vector<2x128xf32> -> vector<2x128xf32>
    %97 = arith.addf %95, %96 : vector<2x128xf32>
    %98 = vector.extract_strided_slice %97 {offsets = [0, 0], sizes = [2, 32], strides = [1, 1]} : vector<2x128xf32> to vector<2x32xf32>
    %99 = arith.negf %98 : vector<2x32xf32>
    %100 = math.exp %99 : vector<2x32xf32>
    %cst_26 = arith.constant 1.000000e+00 : f32
    %101 = vector.broadcast %cst_26 : f32 to vector<2x32xf32>
    %102 = arith.addf %101, %100 : vector<2x32xf32>
    %103 = arith.divf %101, %102 : vector<2x32xf32>
    %104 = vector.extract_strided_slice %97 {offsets = [0, 32], sizes = [2, 32], strides = [1, 1]} : vector<2x128xf32> to vector<2x32xf32>
    %105 = arith.negf %104 : vector<2x32xf32>
    %106 = math.exp %105 : vector<2x32xf32>
    %cst_27 = arith.constant 1.000000e+00 : f32
    %107 = vector.broadcast %cst_27 : f32 to vector<2x32xf32>
    %108 = arith.addf %107, %106 : vector<2x32xf32>
    %109 = arith.divf %107, %108 : vector<2x32xf32>
    %110 = vector.extract_strided_slice %97 {offsets = [0, 64], sizes = [2, 32], strides = [1, 1]} : vector<2x128xf32> to vector<2x32xf32>
    %111 = math.tanh %110 : vector<2x32xf32>
    %112 = vector.extract_strided_slice %97 {offsets = [0, 96], sizes = [2, 32], strides = [1, 1]} : vector<2x128xf32> to vector<2x32xf32>
    %113 = arith.negf %112 : vector<2x32xf32>
    %114 = math.exp %113 : vector<2x32xf32>
    %cst_28 = arith.constant 1.000000e+00 : f32
    %115 = vector.broadcast %cst_28 : f32 to vector<2x32xf32>
    %116 = arith.addf %115, %114 : vector<2x32xf32>
    %117 = arith.divf %115, %116 : vector<2x32xf32>
    %118 = arith.mulf %109, %92 : vector<2x32xf32>
    %119 = arith.mulf %103, %111 : vector<2x32xf32>
    %120 = arith.addf %118, %119 : vector<2x32xf32>
    %121 = math.tanh %120 : vector<2x32xf32>
    %122 = arith.mulf %117, %121 : vector<2x32xf32>
    %123 = vector.extract_strided_slice %6 {offsets = [8, 0], sizes = [2, 128], strides = [1, 1]} : vector<16x128xf32> to vector<2x128xf32>
    %cst_29 = arith.constant dense<0.000000e+00> : vector<2x128xf32>
    %124 = tpu.matmul %122, %2, %cst_29 {dimension_numbers = #tpu.dot_dimension_numbers<[1], [0], [0], [1], [0, 0, 1, 1], [], []>} : vector<2x32xf32>, vector<32x128xf32>, vector<2x128xf32> -> vector<2x128xf32>
    %125 = arith.addf %123, %124 : vector<2x128xf32>
    %126 = vector.extract_strided_slice %125 {offsets = [0, 0], sizes = [2, 32], strides = [1, 1]} : vector<2x128xf32> to vector<2x32xf32>
    %127 = arith.negf %126 : vector<2x32xf32>
    %128 = math.exp %127 : vector<2x32xf32>
    %cst_30 = arith.constant 1.000000e+00 : f32
    %129 = vector.broadcast %cst_30 : f32 to vector<2x32xf32>
    %130 = arith.addf %129, %128 : vector<2x32xf32>
    %131 = arith.divf %129, %130 : vector<2x32xf32>
    %132 = vector.extract_strided_slice %125 {offsets = [0, 32], sizes = [2, 32], strides = [1, 1]} : vector<2x128xf32> to vector<2x32xf32>
    %133 = arith.negf %132 : vector<2x32xf32>
    %134 = math.exp %133 : vector<2x32xf32>
    %cst_31 = arith.constant 1.000000e+00 : f32
    %135 = vector.broadcast %cst_31 : f32 to vector<2x32xf32>
    %136 = arith.addf %135, %134 : vector<2x32xf32>
    %137 = arith.divf %135, %136 : vector<2x32xf32>
    %138 = vector.extract_strided_slice %125 {offsets = [0, 64], sizes = [2, 32], strides = [1, 1]} : vector<2x128xf32> to vector<2x32xf32>
    %139 = math.tanh %138 : vector<2x32xf32>
    %140 = vector.extract_strided_slice %125 {offsets = [0, 96], sizes = [2, 32], strides = [1, 1]} : vector<2x128xf32> to vector<2x32xf32>
    %141 = arith.negf %140 : vector<2x32xf32>
    %142 = math.exp %141 : vector<2x32xf32>
    %cst_32 = arith.constant 1.000000e+00 : f32
    %143 = vector.broadcast %cst_32 : f32 to vector<2x32xf32>
    %144 = arith.addf %143, %142 : vector<2x32xf32>
    %145 = arith.divf %143, %144 : vector<2x32xf32>
    %146 = arith.mulf %137, %120 : vector<2x32xf32>
    %147 = arith.mulf %131, %139 : vector<2x32xf32>
    %148 = arith.addf %146, %147 : vector<2x32xf32>
    %149 = math.tanh %148 : vector<2x32xf32>
    %150 = arith.mulf %145, %149 : vector<2x32xf32>
    %151 = vector.extract_strided_slice %6 {offsets = [10, 0], sizes = [2, 128], strides = [1, 1]} : vector<16x128xf32> to vector<2x128xf32>
    %cst_33 = arith.constant dense<0.000000e+00> : vector<2x128xf32>
    %152 = tpu.matmul %150, %2, %cst_33 {dimension_numbers = #tpu.dot_dimension_numbers<[1], [0], [0], [1], [0, 0, 1, 1], [], []>} : vector<2x32xf32>, vector<32x128xf32>, vector<2x128xf32> -> vector<2x128xf32>
    %153 = arith.addf %151, %152 : vector<2x128xf32>
    %154 = vector.extract_strided_slice %153 {offsets = [0, 0], sizes = [2, 32], strides = [1, 1]} : vector<2x128xf32> to vector<2x32xf32>
    %155 = arith.negf %154 : vector<2x32xf32>
    %156 = math.exp %155 : vector<2x32xf32>
    %cst_34 = arith.constant 1.000000e+00 : f32
    %157 = vector.broadcast %cst_34 : f32 to vector<2x32xf32>
    %158 = arith.addf %157, %156 : vector<2x32xf32>
    %159 = arith.divf %157, %158 : vector<2x32xf32>
    %160 = vector.extract_strided_slice %153 {offsets = [0, 32], sizes = [2, 32], strides = [1, 1]} : vector<2x128xf32> to vector<2x32xf32>
    %161 = arith.negf %160 : vector<2x32xf32>
    %162 = math.exp %161 : vector<2x32xf32>
    %cst_35 = arith.constant 1.000000e+00 : f32
    %163 = vector.broadcast %cst_35 : f32 to vector<2x32xf32>
    %164 = arith.addf %163, %162 : vector<2x32xf32>
    %165 = arith.divf %163, %164 : vector<2x32xf32>
    %166 = vector.extract_strided_slice %153 {offsets = [0, 64], sizes = [2, 32], strides = [1, 1]} : vector<2x128xf32> to vector<2x32xf32>
    %167 = math.tanh %166 : vector<2x32xf32>
    %168 = vector.extract_strided_slice %153 {offsets = [0, 96], sizes = [2, 32], strides = [1, 1]} : vector<2x128xf32> to vector<2x32xf32>
    %169 = arith.negf %168 : vector<2x32xf32>
    %170 = math.exp %169 : vector<2x32xf32>
    %cst_36 = arith.constant 1.000000e+00 : f32
    %171 = vector.broadcast %cst_36 : f32 to vector<2x32xf32>
    %172 = arith.addf %171, %170 : vector<2x32xf32>
    %173 = arith.divf %171, %172 : vector<2x32xf32>
    %174 = arith.mulf %165, %148 : vector<2x32xf32>
    %175 = arith.mulf %159, %167 : vector<2x32xf32>
    %176 = arith.addf %174, %175 : vector<2x32xf32>
    %177 = math.tanh %176 : vector<2x32xf32>
    %178 = arith.mulf %173, %177 : vector<2x32xf32>
    %179 = vector.extract_strided_slice %6 {offsets = [12, 0], sizes = [2, 128], strides = [1, 1]} : vector<16x128xf32> to vector<2x128xf32>
    %cst_37 = arith.constant dense<0.000000e+00> : vector<2x128xf32>
    %180 = tpu.matmul %178, %2, %cst_37 {dimension_numbers = #tpu.dot_dimension_numbers<[1], [0], [0], [1], [0, 0, 1, 1], [], []>} : vector<2x32xf32>, vector<32x128xf32>, vector<2x128xf32> -> vector<2x128xf32>
    %181 = arith.addf %179, %180 : vector<2x128xf32>
    %182 = vector.extract_strided_slice %181 {offsets = [0, 0], sizes = [2, 32], strides = [1, 1]} : vector<2x128xf32> to vector<2x32xf32>
    %183 = arith.negf %182 : vector<2x32xf32>
    %184 = math.exp %183 : vector<2x32xf32>
    %cst_38 = arith.constant 1.000000e+00 : f32
    %185 = vector.broadcast %cst_38 : f32 to vector<2x32xf32>
    %186 = arith.addf %185, %184 : vector<2x32xf32>
    %187 = arith.divf %185, %186 : vector<2x32xf32>
    %188 = vector.extract_strided_slice %181 {offsets = [0, 32], sizes = [2, 32], strides = [1, 1]} : vector<2x128xf32> to vector<2x32xf32>
    %189 = arith.negf %188 : vector<2x32xf32>
    %190 = math.exp %189 : vector<2x32xf32>
    %cst_39 = arith.constant 1.000000e+00 : f32
    %191 = vector.broadcast %cst_39 : f32 to vector<2x32xf32>
    %192 = arith.addf %191, %190 : vector<2x32xf32>
    %193 = arith.divf %191, %192 : vector<2x32xf32>
    %194 = vector.extract_strided_slice %181 {offsets = [0, 64], sizes = [2, 32], strides = [1, 1]} : vector<2x128xf32> to vector<2x32xf32>
    %195 = math.tanh %194 : vector<2x32xf32>
    %196 = vector.extract_strided_slice %181 {offsets = [0, 96], sizes = [2, 32], strides = [1, 1]} : vector<2x128xf32> to vector<2x32xf32>
    %197 = arith.negf %196 : vector<2x32xf32>
    %198 = math.exp %197 : vector<2x32xf32>
    %cst_40 = arith.constant 1.000000e+00 : f32
    %199 = vector.broadcast %cst_40 : f32 to vector<2x32xf32>
    %200 = arith.addf %199, %198 : vector<2x32xf32>
    %201 = arith.divf %199, %200 : vector<2x32xf32>
    %202 = arith.mulf %193, %176 : vector<2x32xf32>
    %203 = arith.mulf %187, %195 : vector<2x32xf32>
    %204 = arith.addf %202, %203 : vector<2x32xf32>
    %205 = math.tanh %204 : vector<2x32xf32>
    %206 = arith.mulf %201, %205 : vector<2x32xf32>
    %207 = vector.extract_strided_slice %6 {offsets = [14, 0], sizes = [2, 128], strides = [1, 1]} : vector<16x128xf32> to vector<2x128xf32>
    %cst_41 = arith.constant dense<0.000000e+00> : vector<2x128xf32>
    %208 = tpu.matmul %206, %2, %cst_41 {dimension_numbers = #tpu.dot_dimension_numbers<[1], [0], [0], [1], [0, 0, 1, 1], [], []>} : vector<2x32xf32>, vector<32x128xf32>, vector<2x128xf32> -> vector<2x128xf32>
    %209 = arith.addf %207, %208 : vector<2x128xf32>
    %210 = vector.extract_strided_slice %209 {offsets = [0, 0], sizes = [2, 32], strides = [1, 1]} : vector<2x128xf32> to vector<2x32xf32>
    %211 = arith.negf %210 : vector<2x32xf32>
    %212 = math.exp %211 : vector<2x32xf32>
    %cst_42 = arith.constant 1.000000e+00 : f32
    %213 = vector.broadcast %cst_42 : f32 to vector<2x32xf32>
    %214 = arith.addf %213, %212 : vector<2x32xf32>
    %215 = arith.divf %213, %214 : vector<2x32xf32>
    %216 = vector.extract_strided_slice %209 {offsets = [0, 32], sizes = [2, 32], strides = [1, 1]} : vector<2x128xf32> to vector<2x32xf32>
    %217 = arith.negf %216 : vector<2x32xf32>
    %218 = math.exp %217 : vector<2x32xf32>
    %cst_43 = arith.constant 1.000000e+00 : f32
    %219 = vector.broadcast %cst_43 : f32 to vector<2x32xf32>
    %220 = arith.addf %219, %218 : vector<2x32xf32>
    %221 = arith.divf %219, %220 : vector<2x32xf32>
    %222 = vector.extract_strided_slice %209 {offsets = [0, 64], sizes = [2, 32], strides = [1, 1]} : vector<2x128xf32> to vector<2x32xf32>
    %223 = math.tanh %222 : vector<2x32xf32>
    %224 = vector.extract_strided_slice %209 {offsets = [0, 96], sizes = [2, 32], strides = [1, 1]} : vector<2x128xf32> to vector<2x32xf32>
    %225 = arith.negf %224 : vector<2x32xf32>
    %226 = math.exp %225 : vector<2x32xf32>
    %cst_44 = arith.constant 1.000000e+00 : f32
    %227 = vector.broadcast %cst_44 : f32 to vector<2x32xf32>
    %228 = arith.addf %227, %226 : vector<2x32xf32>
    %229 = arith.divf %227, %228 : vector<2x32xf32>
    %230 = arith.mulf %221, %204 : vector<2x32xf32>
    %231 = arith.mulf %215, %223 : vector<2x32xf32>
    %232 = arith.addf %230, %231 : vector<2x32xf32>
    %233 = math.tanh %232 : vector<2x32xf32>
    %234 = arith.mulf %229, %233 : vector<2x32xf32>
    %235 = tpu.concatenate %38, %66, %94, %122, %150, %178, %206, %234 in 0 : vector<2x32xf32>, vector<2x32xf32>, vector<2x32xf32>, vector<2x32xf32>, vector<2x32xf32>, vector<2x32xf32>, vector<2x32xf32>, vector<2x32xf32> -> vector<16x32xf32>
    %c0_45 = arith.constant 0 : index
    %c0_46 = arith.constant 0 : index
    %c0_47 = arith.constant 0 : index
    %236 = vector.load %arg12[%c0_45, %c0_46, %c0_47] : memref<2x2x32xf32, #tpu.memory_space<vmem>>, vector<1x2x32xf32>
    %237 = vector.shape_cast %236 : vector<1x2x32xf32> to vector<2x32xf32>
    %238 = vector.shape_cast %234 : vector<2x32xf32> to vector<1x2x32xf32>
    tpu.vector_store %arg12[%c0_45, %c0_46, %c0_47], %238 {strides = array<i32>} : memref<2x2x32xf32, #tpu.memory_space<vmem>>, vector<1x2x32xf32>,
    %c0_48 = arith.constant 0 : index
    %c0_49 = arith.constant 0 : index
    %c0_50 = arith.constant 0 : index
    %239 = vector.load %arg13[%c0_48, %c0_49, %c0_50] : memref<2x2x32xf32, #tpu.memory_space<vmem>>, vector<1x2x32xf32>
    %240 = vector.shape_cast %239 : vector<1x2x32xf32> to vector<2x32xf32>
    %241 = vector.shape_cast %232 : vector<2x32xf32> to vector<1x2x32xf32>
    tpu.vector_store %arg13[%c0_48, %c0_49, %c0_50], %241 {strides = array<i32>} : memref<2x2x32xf32, #tpu.memory_space<vmem>>, vector<1x2x32xf32>,
    %c0_51 = arith.constant 0 : index
    %c0_52 = arith.constant 0 : index
    %242 = vector.load %arg4[%c0_51, %c0_52] : memref<32x128xf32, #tpu.memory_space<vmem>>, vector<32x128xf32>
    %c0_53 = arith.constant 0 : index
    %c0_54 = arith.constant 0 : index
    %243 = vector.load %arg5[%c0_53, %c0_54] : memref<32x128xf32, #tpu.memory_space<vmem>>, vector<32x128xf32>
    %c0_55 = arith.constant 0 : index
    %c0_56 = arith.constant 0 : index
    %244 = vector.load %arg6[%c0_55, %c0_56] : memref<1x128xf32, #tpu.memory_space<vmem>>, vector<1x128xf32>
    %cst_57 = arith.constant dense<0.000000e+00> : vector<16x128xf32>
    %245 = tpu.matmul %235, %242, %cst_57 {dimension_numbers = #tpu.dot_dimension_numbers<[1], [0], [0], [1], [0, 0, 1, 1], [], []>} : vector<16x32xf32>, vector<32x128xf32>, vector<16x128xf32> -> vector<16x128xf32>
    %246 = vector.broadcast %244 : vector<1x128xf32> to vector<16x128xf32>
    %247 = arith.addf %245, %246 : vector<16x128xf32>
    %c1 = arith.constant 1 : index
    %c0_58 = arith.constant 0 : index
    %c0_59 = arith.constant 0 : index
    %248 = vector.load %arg7[%c1, %c0_58, %c0_59] : memref<2x2x32xf32, #tpu.memory_space<vmem>>, vector<1x2x32xf32>
    %249 = vector.shape_cast %248 : vector<1x2x32xf32> to vector<2x32xf32>
    %c1_60 = arith.constant 1 : index
    %c0_61 = arith.constant 0 : index
    %c0_62 = arith.constant 0 : index
    %250 = vector.load %arg8[%c1_60, %c0_61, %c0_62] : memref<2x2x32xf32, #tpu.memory_space<vmem>>, vector<1x2x32xf32>
    %251 = vector.shape_cast %250 : vector<1x2x32xf32> to vector<2x32xf32>
    %252 = vector.extract_strided_slice %247 {offsets = [0, 0], sizes = [2, 128], strides = [1, 1]} : vector<16x128xf32> to vector<2x128xf32>
    %cst_63 = arith.constant dense<0.000000e+00> : vector<2x128xf32>
    %253 = tpu.matmul %249, %243, %cst_63 {dimension_numbers = #tpu.dot_dimension_numbers<[1], [0], [0], [1], [0, 0, 1, 1], [], []>} : vector<2x32xf32>, vector<32x128xf32>, vector<2x128xf32> -> vector<2x128xf32>
    %254 = arith.addf %252, %253 : vector<2x128xf32>
    %255 = vector.extract_strided_slice %254 {offsets = [0, 0], sizes = [2, 32], strides = [1, 1]} : vector<2x128xf32> to vector<2x32xf32>
    %256 = arith.negf %255 : vector<2x32xf32>
    %257 = math.exp %256 : vector<2x32xf32>
    %cst_64 = arith.constant 1.000000e+00 : f32
    %258 = vector.broadcast %cst_64 : f32 to vector<2x32xf32>
    %259 = arith.addf %258, %257 : vector<2x32xf32>
    %260 = arith.divf %258, %259 : vector<2x32xf32>
    %261 = vector.extract_strided_slice %254 {offsets = [0, 32], sizes = [2, 32], strides = [1, 1]} : vector<2x128xf32> to vector<2x32xf32>
    %262 = arith.negf %261 : vector<2x32xf32>
    %263 = math.exp %262 : vector<2x32xf32>
    %cst_65 = arith.constant 1.000000e+00 : f32
    %264 = vector.broadcast %cst_65 : f32 to vector<2x32xf32>
    %265 = arith.addf %264, %263 : vector<2x32xf32>
    %266 = arith.divf %264, %265 : vector<2x32xf32>
    %267 = vector.extract_strided_slice %254 {offsets = [0, 64], sizes = [2, 32], strides = [1, 1]} : vector<2x128xf32> to vector<2x32xf32>
    %268 = math.tanh %267 : vector<2x32xf32>
    %269 = vector.extract_strided_slice %254 {offsets = [0, 96], sizes = [2, 32], strides = [1, 1]} : vector<2x128xf32> to vector<2x32xf32>
    %270 = arith.negf %269 : vector<2x32xf32>
    %271 = math.exp %270 : vector<2x32xf32>
    %cst_66 = arith.constant 1.000000e+00 : f32
    %272 = vector.broadcast %cst_66 : f32 to vector<2x32xf32>
    %273 = arith.addf %272, %271 : vector<2x32xf32>
    %274 = arith.divf %272, %273 : vector<2x32xf32>
    %275 = arith.mulf %266, %251 : vector<2x32xf32>
    %276 = arith.mulf %260, %268 : vector<2x32xf32>
    %277 = arith.addf %275, %276 : vector<2x32xf32>
    %278 = math.tanh %277 : vector<2x32xf32>
    %279 = arith.mulf %274, %278 : vector<2x32xf32>
    %280 = vector.extract_strided_slice %247 {offsets = [2, 0], sizes = [2, 128], strides = [1, 1]} : vector<16x128xf32> to vector<2x128xf32>
    %cst_67 = arith.constant dense<0.000000e+00> : vector<2x128xf32>
    %281 = tpu.matmul %279, %243, %cst_67 {dimension_numbers = #tpu.dot_dimension_numbers<[1], [0], [0], [1], [0, 0, 1, 1], [], []>} : vector<2x32xf32>, vector<32x128xf32>, vector<2x128xf32> -> vector<2x128xf32>
    %282 = arith.addf %280, %281 : vector<2x128xf32>
    %283 = vector.extract_strided_slice %282 {offsets = [0, 0], sizes = [2, 32], strides = [1, 1]} : vector<2x128xf32> to vector<2x32xf32>
    %284 = arith.negf %283 : vector<2x32xf32>
    %285 = math.exp %284 : vector<2x32xf32>
    %cst_68 = arith.constant 1.000000e+00 : f32
    %286 = vector.broadcast %cst_68 : f32 to vector<2x32xf32>
    %287 = arith.addf %286, %285 : vector<2x32xf32>
    %288 = arith.divf %286, %287 : vector<2x32xf32>
    %289 = vector.extract_strided_slice %282 {offsets = [0, 32], sizes = [2, 32], strides = [1, 1]} : vector<2x128xf32> to vector<2x32xf32>
    %290 = arith.negf %289 : vector<2x32xf32>
    %291 = math.exp %290 : vector<2x32xf32>
    %cst_69 = arith.constant 1.000000e+00 : f32
    %292 = vector.broadcast %cst_69 : f32 to vector<2x32xf32>
    %293 = arith.addf %292, %291 : vector<2x32xf32>
    %294 = arith.divf %292, %293 : vector<2x32xf32>
    %295 = vector.extract_strided_slice %282 {offsets = [0, 64], sizes = [2, 32], strides = [1, 1]} : vector<2x128xf32> to vector<2x32xf32>
    %296 = math.tanh %295 : vector<2x32xf32>
    %297 = vector.extract_strided_slice %282 {offsets = [0, 96], sizes = [2, 32], strides = [1, 1]} : vector<2x128xf32> to vector<2x32xf32>
    %298 = arith.negf %297 : vector<2x32xf32>
    %299 = math.exp %298 : vector<2x32xf32>
    %cst_70 = arith.constant 1.000000e+00 : f32
    %300 = vector.broadcast %cst_70 : f32 to vector<2x32xf32>
    %301 = arith.addf %300, %299 : vector<2x32xf32>
    %302 = arith.divf %300, %301 : vector<2x32xf32>
    %303 = arith.mulf %294, %277 : vector<2x32xf32>
    %304 = arith.mulf %288, %296 : vector<2x32xf32>
    %305 = arith.addf %303, %304 : vector<2x32xf32>
    %306 = math.tanh %305 : vector<2x32xf32>
    %307 = arith.mulf %302, %306 : vector<2x32xf32>
    %308 = vector.extract_strided_slice %247 {offsets = [4, 0], sizes = [2, 128], strides = [1, 1]} : vector<16x128xf32> to vector<2x128xf32>
    %cst_71 = arith.constant dense<0.000000e+00> : vector<2x128xf32>
    %309 = tpu.matmul %307, %243, %cst_71 {dimension_numbers = #tpu.dot_dimension_numbers<[1], [0], [0], [1], [0, 0, 1, 1], [], []>} : vector<2x32xf32>, vector<32x128xf32>, vector<2x128xf32> -> vector<2x128xf32>
    %310 = arith.addf %308, %309 : vector<2x128xf32>
    %311 = vector.extract_strided_slice %310 {offsets = [0, 0], sizes = [2, 32], strides = [1, 1]} : vector<2x128xf32> to vector<2x32xf32>
    %312 = arith.negf %311 : vector<2x32xf32>
    %313 = math.exp %312 : vector<2x32xf32>
    %cst_72 = arith.constant 1.000000e+00 : f32
    %314 = vector.broadcast %cst_72 : f32 to vector<2x32xf32>
    %315 = arith.addf %314, %313 : vector<2x32xf32>
    %316 = arith.divf %314, %315 : vector<2x32xf32>
    %317 = vector.extract_strided_slice %310 {offsets = [0, 32], sizes = [2, 32], strides = [1, 1]} : vector<2x128xf32> to vector<2x32xf32>
    %318 = arith.negf %317 : vector<2x32xf32>
    %319 = math.exp %318 : vector<2x32xf32>
    %cst_73 = arith.constant 1.000000e+00 : f32
    %320 = vector.broadcast %cst_73 : f32 to vector<2x32xf32>
    %321 = arith.addf %320, %319 : vector<2x32xf32>
    %322 = arith.divf %320, %321 : vector<2x32xf32>
    %323 = vector.extract_strided_slice %310 {offsets = [0, 64], sizes = [2, 32], strides = [1, 1]} : vector<2x128xf32> to vector<2x32xf32>
    %324 = math.tanh %323 : vector<2x32xf32>
    %325 = vector.extract_strided_slice %310 {offsets = [0, 96], sizes = [2, 32], strides = [1, 1]} : vector<2x128xf32> to vector<2x32xf32>
    %326 = arith.negf %325 : vector<2x32xf32>
    %327 = math.exp %326 : vector<2x32xf32>
    %cst_74 = arith.constant 1.000000e+00 : f32
    %328 = vector.broadcast %cst_74 : f32 to vector<2x32xf32>
    %329 = arith.addf %328, %327 : vector<2x32xf32>
    %330 = arith.divf %328, %329 : vector<2x32xf32>
    %331 = arith.mulf %322, %305 : vector<2x32xf32>
    %332 = arith.mulf %316, %324 : vector<2x32xf32>
    %333 = arith.addf %331, %332 : vector<2x32xf32>
    %334 = math.tanh %333 : vector<2x32xf32>
    %335 = arith.mulf %330, %334 : vector<2x32xf32>
    %336 = vector.extract_strided_slice %247 {offsets = [6, 0], sizes = [2, 128], strides = [1, 1]} : vector<16x128xf32> to vector<2x128xf32>
    %cst_75 = arith.constant dense<0.000000e+00> : vector<2x128xf32>
    %337 = tpu.matmul %335, %243, %cst_75 {dimension_numbers = #tpu.dot_dimension_numbers<[1], [0], [0], [1], [0, 0, 1, 1], [], []>} : vector<2x32xf32>, vector<32x128xf32>, vector<2x128xf32> -> vector<2x128xf32>
    %338 = arith.addf %336, %337 : vector<2x128xf32>
    %339 = vector.extract_strided_slice %338 {offsets = [0, 0], sizes = [2, 32], strides = [1, 1]} : vector<2x128xf32> to vector<2x32xf32>
    %340 = arith.negf %339 : vector<2x32xf32>
    %341 = math.exp %340 : vector<2x32xf32>
    %cst_76 = arith.constant 1.000000e+00 : f32
    %342 = vector.broadcast %cst_76 : f32 to vector<2x32xf32>
    %343 = arith.addf %342, %341 : vector<2x32xf32>
    %344 = arith.divf %342, %343 : vector<2x32xf32>
    %345 = vector.extract_strided_slice %338 {offsets = [0, 32], sizes = [2, 32], strides = [1, 1]} : vector<2x128xf32> to vector<2x32xf32>
    %346 = arith.negf %345 : vector<2x32xf32>
    %347 = math.exp %346 : vector<2x32xf32>
    %cst_77 = arith.constant 1.000000e+00 : f32
    %348 = vector.broadcast %cst_77 : f32 to vector<2x32xf32>
    %349 = arith.addf %348, %347 : vector<2x32xf32>
    %350 = arith.divf %348, %349 : vector<2x32xf32>
    %351 = vector.extract_strided_slice %338 {offsets = [0, 64], sizes = [2, 32], strides = [1, 1]} : vector<2x128xf32> to vector<2x32xf32>
    %352 = math.tanh %351 : vector<2x32xf32>
    %353 = vector.extract_strided_slice %338 {offsets = [0, 96], sizes = [2, 32], strides = [1, 1]} : vector<2x128xf32> to vector<2x32xf32>
    %354 = arith.negf %353 : vector<2x32xf32>
    %355 = math.exp %354 : vector<2x32xf32>
    %cst_78 = arith.constant 1.000000e+00 : f32
    %356 = vector.broadcast %cst_78 : f32 to vector<2x32xf32>
    %357 = arith.addf %356, %355 : vector<2x32xf32>
    %358 = arith.divf %356, %357 : vector<2x32xf32>
    %359 = arith.mulf %350, %333 : vector<2x32xf32>
    %360 = arith.mulf %344, %352 : vector<2x32xf32>
    %361 = arith.addf %359, %360 : vector<2x32xf32>
    %362 = math.tanh %361 : vector<2x32xf32>
    %363 = arith.mulf %358, %362 : vector<2x32xf32>
    %364 = vector.extract_strided_slice %247 {offsets = [8, 0], sizes = [2, 128], strides = [1, 1]} : vector<16x128xf32> to vector<2x128xf32>
    %cst_79 = arith.constant dense<0.000000e+00> : vector<2x128xf32>
    %365 = tpu.matmul %363, %243, %cst_79 {dimension_numbers = #tpu.dot_dimension_numbers<[1], [0], [0], [1], [0, 0, 1, 1], [], []>} : vector<2x32xf32>, vector<32x128xf32>, vector<2x128xf32> -> vector<2x128xf32>
    %366 = arith.addf %364, %365 : vector<2x128xf32>
    %367 = vector.extract_strided_slice %366 {offsets = [0, 0], sizes = [2, 32], strides = [1, 1]} : vector<2x128xf32> to vector<2x32xf32>
    %368 = arith.negf %367 : vector<2x32xf32>
    %369 = math.exp %368 : vector<2x32xf32>
    %cst_80 = arith.constant 1.000000e+00 : f32
    %370 = vector.broadcast %cst_80 : f32 to vector<2x32xf32>
    %371 = arith.addf %370, %369 : vector<2x32xf32>
    %372 = arith.divf %370, %371 : vector<2x32xf32>
    %373 = vector.extract_strided_slice %366 {offsets = [0, 32], sizes = [2, 32], strides = [1, 1]} : vector<2x128xf32> to vector<2x32xf32>
    %374 = arith.negf %373 : vector<2x32xf32>
    %375 = math.exp %374 : vector<2x32xf32>
    %cst_81 = arith.constant 1.000000e+00 : f32
    %376 = vector.broadcast %cst_81 : f32 to vector<2x32xf32>
    %377 = arith.addf %376, %375 : vector<2x32xf32>
    %378 = arith.divf %376, %377 : vector<2x32xf32>
    %379 = vector.extract_strided_slice %366 {offsets = [0, 64], sizes = [2, 32], strides = [1, 1]} : vector<2x128xf32> to vector<2x32xf32>
    %380 = math.tanh %379 : vector<2x32xf32>
    %381 = vector.extract_strided_slice %366 {offsets = [0, 96], sizes = [2, 32], strides = [1, 1]} : vector<2x128xf32> to vector<2x32xf32>
    %382 = arith.negf %381 : vector<2x32xf32>
    %383 = math.exp %382 : vector<2x32xf32>
    %cst_82 = arith.constant 1.000000e+00 : f32
    %384 = vector.broadcast %cst_82 : f32 to vector<2x32xf32>
    %385 = arith.addf %384, %383 : vector<2x32xf32>
    %386 = arith.divf %384, %385 : vector<2x32xf32>
    %387 = arith.mulf %378, %361 : vector<2x32xf32>
    %388 = arith.mulf %372, %380 : vector<2x32xf32>
    %389 = arith.addf %387, %388 : vector<2x32xf32>
    %390 = math.tanh %389 : vector<2x32xf32>
    %391 = arith.mulf %386, %390 : vector<2x32xf32>
    %392 = vector.extract_strided_slice %247 {offsets = [10, 0], sizes = [2, 128], strides = [1, 1]} : vector<16x128xf32> to vector<2x128xf32>
    %cst_83 = arith.constant dense<0.000000e+00> : vector<2x128xf32>
    %393 = tpu.matmul %391, %243, %cst_83 {dimension_numbers = #tpu.dot_dimension_numbers<[1], [0], [0], [1], [0, 0, 1, 1], [], []>} : vector<2x32xf32>, vector<32x128xf32>, vector<2x128xf32> -> vector<2x128xf32>
    %394 = arith.addf %392, %393 : vector<2x128xf32>
    %395 = vector.extract_strided_slice %394 {offsets = [0, 0], sizes = [2, 32], strides = [1, 1]} : vector<2x128xf32> to vector<2x32xf32>
    %396 = arith.negf %395 : vector<2x32xf32>
    %397 = math.exp %396 : vector<2x32xf32>
    %cst_84 = arith.constant 1.000000e+00 : f32
    %398 = vector.broadcast %cst_84 : f32 to vector<2x32xf32>
    %399 = arith.addf %398, %397 : vector<2x32xf32>
    %400 = arith.divf %398, %399 : vector<2x32xf32>
    %401 = vector.extract_strided_slice %394 {offsets = [0, 32], sizes = [2, 32], strides = [1, 1]} : vector<2x128xf32> to vector<2x32xf32>
    %402 = arith.negf %401 : vector<2x32xf32>
    %403 = math.exp %402 : vector<2x32xf32>
    %cst_85 = arith.constant 1.000000e+00 : f32
    %404 = vector.broadcast %cst_85 : f32 to vector<2x32xf32>
    %405 = arith.addf %404, %403 : vector<2x32xf32>
    %406 = arith.divf %404, %405 : vector<2x32xf32>
    %407 = vector.extract_strided_slice %394 {offsets = [0, 64], sizes = [2, 32], strides = [1, 1]} : vector<2x128xf32> to vector<2x32xf32>
    %408 = math.tanh %407 : vector<2x32xf32>
    %409 = vector.extract_strided_slice %394 {offsets = [0, 96], sizes = [2, 32], strides = [1, 1]} : vector<2x128xf32> to vector<2x32xf32>
    %410 = arith.negf %409 : vector<2x32xf32>
    %411 = math.exp %410 : vector<2x32xf32>
    %cst_86 = arith.constant 1.000000e+00 : f32
    %412 = vector.broadcast %cst_86 : f32 to vector<2x32xf32>
    %413 = arith.addf %412, %411 : vector<2x32xf32>
    %414 = arith.divf %412, %413 : vector<2x32xf32>
    %415 = arith.mulf %406, %389 : vector<2x32xf32>
    %416 = arith.mulf %400, %408 : vector<2x32xf32>
    %417 = arith.addf %415, %416 : vector<2x32xf32>
    %418 = math.tanh %417 : vector<2x32xf32>
    %419 = arith.mulf %414, %418 : vector<2x32xf32>
    %420 = vector.extract_strided_slice %247 {offsets = [12, 0], sizes = [2, 128], strides = [1, 1]} : vector<16x128xf32> to vector<2x128xf32>
    %cst_87 = arith.constant dense<0.000000e+00> : vector<2x128xf32>
    %421 = tpu.matmul %419, %243, %cst_87 {dimension_numbers = #tpu.dot_dimension_numbers<[1], [0], [0], [1], [0, 0, 1, 1], [], []>} : vector<2x32xf32>, vector<32x128xf32>, vector<2x128xf32> -> vector<2x128xf32>
    %422 = arith.addf %420, %421 : vector<2x128xf32>
    %423 = vector.extract_strided_slice %422 {offsets = [0, 0], sizes = [2, 32], strides = [1, 1]} : vector<2x128xf32> to vector<2x32xf32>
    %424 = arith.negf %423 : vector<2x32xf32>
    %425 = math.exp %424 : vector<2x32xf32>
    %cst_88 = arith.constant 1.000000e+00 : f32
    %426 = vector.broadcast %cst_88 : f32 to vector<2x32xf32>
    %427 = arith.addf %426, %425 : vector<2x32xf32>
    %428 = arith.divf %426, %427 : vector<2x32xf32>
    %429 = vector.extract_strided_slice %422 {offsets = [0, 32], sizes = [2, 32], strides = [1, 1]} : vector<2x128xf32> to vector<2x32xf32>
    %430 = arith.negf %429 : vector<2x32xf32>
    %431 = math.exp %430 : vector<2x32xf32>
    %cst_89 = arith.constant 1.000000e+00 : f32
    %432 = vector.broadcast %cst_89 : f32 to vector<2x32xf32>
    %433 = arith.addf %432, %431 : vector<2x32xf32>
    %434 = arith.divf %432, %433 : vector<2x32xf32>
    %435 = vector.extract_strided_slice %422 {offsets = [0, 64], sizes = [2, 32], strides = [1, 1]} : vector<2x128xf32> to vector<2x32xf32>
    %436 = math.tanh %435 : vector<2x32xf32>
    %437 = vector.extract_strided_slice %422 {offsets = [0, 96], sizes = [2, 32], strides = [1, 1]} : vector<2x128xf32> to vector<2x32xf32>
    %438 = arith.negf %437 : vector<2x32xf32>
    %439 = math.exp %438 : vector<2x32xf32>
    %cst_90 = arith.constant 1.000000e+00 : f32
    %440 = vector.broadcast %cst_90 : f32 to vector<2x32xf32>
    %441 = arith.addf %440, %439 : vector<2x32xf32>
    %442 = arith.divf %440, %441 : vector<2x32xf32>
    %443 = arith.mulf %434, %417 : vector<2x32xf32>
    %444 = arith.mulf %428, %436 : vector<2x32xf32>
    %445 = arith.addf %443, %444 : vector<2x32xf32>
    %446 = math.tanh %445 : vector<2x32xf32>
    %447 = arith.mulf %442, %446 : vector<2x32xf32>
    %448 = vector.extract_strided_slice %247 {offsets = [14, 0], sizes = [2, 128], strides = [1, 1]} : vector<16x128xf32> to vector<2x128xf32>
    %cst_91 = arith.constant dense<0.000000e+00> : vector<2x128xf32>
    %449 = tpu.matmul %447, %243, %cst_91 {dimension_numbers = #tpu.dot_dimension_numbers<[1], [0], [0], [1], [0, 0, 1, 1], [], []>} : vector<2x32xf32>, vector<32x128xf32>, vector<2x128xf32> -> vector<2x128xf32>
    %450 = arith.addf %448, %449 : vector<2x128xf32>
    %451 = vector.extract_strided_slice %450 {offsets = [0, 0], sizes = [2, 32], strides = [1, 1]} : vector<2x128xf32> to vector<2x32xf32>
    %452 = arith.negf %451 : vector<2x32xf32>
    %453 = math.exp %452 : vector<2x32xf32>
    %cst_92 = arith.constant 1.000000e+00 : f32
    %454 = vector.broadcast %cst_92 : f32 to vector<2x32xf32>
    %455 = arith.addf %454, %453 : vector<2x32xf32>
    %456 = arith.divf %454, %455 : vector<2x32xf32>
    %457 = vector.extract_strided_slice %450 {offsets = [0, 32], sizes = [2, 32], strides = [1, 1]} : vector<2x128xf32> to vector<2x32xf32>
    %458 = arith.negf %457 : vector<2x32xf32>
    %459 = math.exp %458 : vector<2x32xf32>
    %cst_93 = arith.constant 1.000000e+00 : f32
    %460 = vector.broadcast %cst_93 : f32 to vector<2x32xf32>
    %461 = arith.addf %460, %459 : vector<2x32xf32>
    %462 = arith.divf %460, %461 : vector<2x32xf32>
    %463 = vector.extract_strided_slice %450 {offsets = [0, 64], sizes = [2, 32], strides = [1, 1]} : vector<2x128xf32> to vector<2x32xf32>
    %464 = math.tanh %463 : vector<2x32xf32>
    %465 = vector.extract_strided_slice %450 {offsets = [0, 96], sizes = [2, 32], strides = [1, 1]} : vector<2x128xf32> to vector<2x32xf32>
    %466 = arith.negf %465 : vector<2x32xf32>
    %467 = math.exp %466 : vector<2x32xf32>
    %cst_94 = arith.constant 1.000000e+00 : f32
    %468 = vector.broadcast %cst_94 : f32 to vector<2x32xf32>
    %469 = arith.addf %468, %467 : vector<2x32xf32>
    %470 = arith.divf %468, %469 : vector<2x32xf32>
    %471 = arith.mulf %462, %445 : vector<2x32xf32>
    %472 = arith.mulf %456, %464 : vector<2x32xf32>
    %473 = arith.addf %471, %472 : vector<2x32xf32>
    %474 = math.tanh %473 : vector<2x32xf32>
    %475 = arith.mulf %470, %474 : vector<2x32xf32>
    %476 = tpu.concatenate %279, %307, %335, %363, %391, %419, %447, %475 in 0 : vector<2x32xf32>, vector<2x32xf32>, vector<2x32xf32>, vector<2x32xf32>, vector<2x32xf32>, vector<2x32xf32>, vector<2x32xf32>, vector<2x32xf32> -> vector<16x32xf32>
    %c1_95 = arith.constant 1 : index
    %c0_96 = arith.constant 0 : index
    %c0_97 = arith.constant 0 : index
    %477 = vector.load %arg12[%c1_95, %c0_96, %c0_97] : memref<2x2x32xf32, #tpu.memory_space<vmem>>, vector<1x2x32xf32>
    %478 = vector.shape_cast %477 : vector<1x2x32xf32> to vector<2x32xf32>
    %479 = vector.shape_cast %475 : vector<2x32xf32> to vector<1x2x32xf32>
    tpu.vector_store %arg12[%c1_95, %c0_96, %c0_97], %479 {strides = array<i32>} : memref<2x2x32xf32, #tpu.memory_space<vmem>>, vector<1x2x32xf32>,
    %c1_98 = arith.constant 1 : index
    %c0_99 = arith.constant 0 : index
    %c0_100 = arith.constant 0 : index
    %480 = vector.load %arg13[%c1_98, %c0_99, %c0_100] : memref<2x2x32xf32, #tpu.memory_space<vmem>>, vector<1x2x32xf32>
    %481 = vector.shape_cast %480 : vector<1x2x32xf32> to vector<2x32xf32>
    %482 = vector.shape_cast %473 : vector<2x32xf32> to vector<1x2x32xf32>
    tpu.vector_store %arg13[%c1_98, %c0_99, %c0_100], %482 {strides = array<i32>} : memref<2x2x32xf32, #tpu.memory_space<vmem>>, vector<1x2x32xf32>,
    %c0_101 = arith.constant 0 : index
    %c0_102 = arith.constant 0 : index
    %483 = vector.load %arg9[%c0_101, %c0_102] : memref<32x32xf32, #tpu.memory_space<vmem>>, vector<32x32xf32>
    %cst_103 = arith.constant dense<0.000000e+00> : vector<16x32xf32>
    %484 = tpu.matmul %476, %483, %cst_103 {dimension_numbers = #tpu.dot_dimension_numbers<[1], [0], [0], [1], [0, 0, 1, 1], [], []>} : vector<16x32xf32>, vector<32x32xf32>, vector<16x32xf32> -> vector<16x32xf32>
    %c0_104 = arith.constant 0 : index
    %c0_105 = arith.constant 0 : index
    %485 = vector.load %arg10[%c0_104, %c0_105] : memref<1x32xf32, #tpu.memory_space<vmem>>, vector<1x32xf32>
    %486 = vector.broadcast %485 : vector<1x32xf32> to vector<16x32xf32>
    %487 = arith.addf %484, %486 : vector<16x32xf32>
    %cst_106 = arith.constant dense<0xFF800000> : vector<16xf32>
    %488 = vector.multi_reduction <maximumf>, %487, %cst_106 [1] : vector<16x32xf32> to vector<16xf32>
    %489 = vector.shape_cast %488 : vector<16xf32> to vector<16x1xf32>
    %490 = vector.broadcast %489 : vector<16x1xf32> to vector<16x32xf32>
    %491 = arith.subf %487, %490 : vector<16x32xf32>
    %492 = math.exp %491 : vector<16x32xf32>
    %cst_107 = arith.constant dense<0.000000e+00> : vector<16xf32>
    %493 = vector.multi_reduction <add>, %492, %cst_107 [1] : vector<16x32xf32> to vector<16xf32>
    %494 = vector.shape_cast %493 : vector<16xf32> to vector<16x1xf32>
    %495 = math.log %494 : vector<16x1xf32>
    %496 = vector.broadcast %495 : vector<16x1xf32> to vector<16x32xf32>
    %497 = arith.subf %491, %496 : vector<16x32xf32>
    %c0_108 = arith.constant 0 : index
    %c0_109 = arith.constant 0 : index
    %498 = vector.load %arg11[%c0_108, %c0_109] : memref<16x32xf32, #tpu.memory_space<vmem>>, vector<16x32xf32>
    tpu.vector_store %arg11[%c0_108, %c0_109], %497 {strides = array<i32>} : memref<16x32xf32, #tpu.memory_space<vmem>>, vector<16x32xf32>,
    return
  }
}

</mosaic_0001>

<bundles_post_ra>
// kernel: rnn_model_forward.1
= control target key start
LH: loop header
LB: loop body
LE: loop exit
PB: predicated region body
PF: predicated region fallthrough
CT: control target
= control target key end

     0   :  { %19 = vsyncpa [#allocation3], 0  ;;  %vm60_vm0 = vcmask 261120   ;;  %v2835_v4 = vmov 0.0|0.0   ;;  %vm2836_vm1 = vmmov 0   ;;  %v2837_v13 = vmov 0.0   ;;  %s3331_s0 = inlined_call_operand.vmem [shape: f32[16,32], index: 0, kind: input, shape index: {}]   ;;  %s3332_s1 = inlined_call_operand.vmem [shape: f32[32,128], index: 1, kind: input, shape index: {}]   ;;  %s3333_s2 = inlined_call_operand.vmem [shape: f32[32,128], index: 2, kind: input, shape index: {}]   ;;  %s3334_s3 = inlined_call_operand.vmem [shape: f32[1,128], index: 3, kind: input, shape index: {}]   ;;  %s3335_s4 = inlined_call_operand.vmem [shape: f32[32,128], index: 4, kind: input, shape index: {}]   ;;  %s3336_s5 = inlined_call_operand.vmem [shape: f32[32,128], index: 5, kind: input, shape index: {}]   ;;  %s3337_s6 = inlined_call_operand.vmem [shape: f32[1,128], index: 6, kind: input, shape index: {}]   ;;  %s3338_s7 = inlined_call_operand.vmem [shape: f32[2,2,32], index: 7, kind: input, shape index: {}]   ;;  %s3339_s8 = inlined_call_operand.vmem [shape: f32[2,2,32], index: 8, kind: input, shape index: {}]   ;;  %s3340_s9 = inlined_call_operand.vmem [shape: f32[32,32], index: 9, kind: input, shape index: {}]   ;;  %s3341_s10 = inlined_call_operand.vmem [shape: f32[1,32], index: 10, kind: input, shape index: {}]   ;;  %s3342_s11 = inlined_call_operand.hbm [shape: f32[16,32], index: 11, kind: output, shape index: {0}]   ;;  %s3343_s12 = inlined_call_operand.hbm [shape: f32[2,2,32], index: 12, kind: output, shape index: {1}]   ;;  %s3344_s13 = inlined_call_operand.hbm [shape: f32[2,2,32], index: 13, kind: output, shape index: {2}]  }
   0x1   :  { %v45_v0 = vld [vmem:[%s3332_s1] sm:$0xff]  ;;  %v46_v1 = vld [vmem:[%s3332_s1 + $0x8] sm:$0xff]  ;;  %2505 = vmatprep.subr.bf16.mxu1 %v2835_v4  ;;  %v47_v6 = vld [vmem:[%s3332_s1 + $0x10] sm:$0xff]  ;;  %2307 = vmatprep.mubr.msk.f32.mxu1 %vm2836_vm1, %v2837_v13 }
   0x2   :  { %v49_v2 = vld [vmem:[%s3333_s2] sm:$0xff]  ;;  %v2497_v3 = vpack.c.bf16 %v46_v1, %v45_v0  ;;  %v50_v5 = vld [vmem:[%s3333_s2 + $0x8] sm:$0xff]  ;;  %v48_v7 = vld [vmem:[%s3332_s1 + $0x18] sm:$0xff] }
   0x3   :  { %v2936_v8 = vpack.c.bf16 %v50_v5, %v49_v2  ;;  %v2501_v9 = vpack.c.bf16 %v48_v7, %v47_v6  ;;  %v43_v10 = vld [vmem:[%s3331_s0] sm:$0xff]  ;;  %v51_v11 = vld [vmem:[%s3333_s2 + $0x10] sm:$0xff]  ;;  %v52_v12 = vld [vmem:[%s3333_s2 + $0x18] sm:$0xff] }
   0x4   :  { %2498 = vmatprep.subr.bf16.mxu0 %v2497_v3  ;;  %2296 = vmatprep.mubr.msk.f32.mxu0 %vm60_vm0, %v43_v10 }
   0x5   :  { %20 = vsyncpa [#allocation5], 0  ;;  %2500 = vmatpush3.bf16.msra.mxu0 %v2497_v3  ;;  %2507 = vmatpush3.bf16.msra.mxu1 %v2936_v8  ;;  %v2951_v14 = vpack.c.bf16 %v52_v12, %v51_v11  ;;  %v44_v15 = vld [vmem:[%s3331_s0 + $0x8] sm:$0xff]  ;;  %v142_v16 = vld [vmem:[%s3338_s7] sm:$0x3]  ;;  %s2838_s29 = smov 64  }
   0x6   :  { %2502 = vmatprep.subr.bf16.mxu0 %v2501_v9  ;;  %2508 = vmatprep.subr.bf16.mxu1 %v2835_v4  ;;  %v2147_v17 = vld [vmem:[%s3334_s3] ss:$0 sm:$0xff]  ;;  %s2839_s3 = smov 32   ;;  %vm990_vm2 = vcmask 1041408   ;;  %vm992_vm3 = vcmask 1043456   ;;  %vm994_vm4 = vcmask 1045504  }
   0x7   :  { %v143_v26 = vld [vmem:[%s3339_s8] sm:$0x3]  ;;  %vm1003_vm5 = vcmask 261126   ;;  %s2842_s23 = smov [#allocation6]  }
   0x8   :  { %s2129_s24 = sshll.u32 %s2842_s23, 4  ;;  %s3279_s24 = int_to_ptr.vmem [resolvable:$true] %s2129_s24 }
   0x9   :  { %2504 = vmatpush3.bf16.msra.mxu0 %v2501_v9  ;;  %2510 = vmatpush3.bf16.msra.mxu1 %v2951_v14 }
   0xa   :  { %2511 = vmatprep.subr.bf16.mxu0 %v2835_v4  ;;  %2517 = vmatprep.subr.bf16.mxu1 %v2835_v4 }
   0xc   :  { %2297 = vmatmul.mubr.msk.f32.vlgmr.msra.gmra.mrb[0].mxu0 %vm60_vm0, %v44_v15  ;;  %2308 = vmatmul.mubr.msk.f32.vlgmr.msra.gmra.mrb[0].mxu1 %vm60_vm0, %v142_v16 }
   0xd   :  { %2513 = vmatpush3.bf16.msra.mxu0 %v2936_v8  ;;  %2318 = vmatprep.mubr.msk.f32.mxu0 %vm2836_vm1, %v2837_v13 }
   0xe   :  { %2514 = vmatprep.subr.bf16.mxu0 %v2835_v4  ;;  %2519 = vmatpush3.bf16.msra.mxu1 %v2936_v8 }
   0xf   :  { %2520 = vmatprep.subr.bf16.mxu1 %v2835_v4  ;;  %2329 = vmatprep.mubr.msk.f32.mxu1 %vm2836_vm1, %v2837_v13 }
  0x11   :  { %2516 = vmatpush3.bf16.msra.mxu0 %v2951_v14 }
  0x12   :  { %2522 = vmatpush3.bf16.msra.mxu1 %v2951_v14  ;;  %2523 = vmatprep.subr.bf16.mxu0 %v2835_v4 }
  0x13   :  { %2529 = vmatprep.subr.bf16.mxu1 %v2835_v4 }
  0xdf   :  { %v2298_v18 = vpop.f32.mrb[0].mxu0  ;;  %v213_v19 = vpop.f32.mrb[0].mxu1 }
  0xe0   :  { %v2980_v20 = vadd.f32 %v2298_v18, %v2147_v17  ;;  %v133_v21 = vpop.f32.mrb[1].mxu0  ;;  %v2309_v22 = vpop.f32.mrb[1].mxu1 }
  0xe1   :  { %v2982_v23 = vadd.f32 %v2147_v17, %v133_v21 }
  0xe3   :  { %v217_v24 = vadd.f32 %v213_v19, %v2982_v23 }
  0xe5   :  { %2629 = vtanh.f32 %v217_v24  ;;  %v2151_v27 = vmul.f32 -1.442695, %v217_v24 }
  0xe7   :  { %2631 = vpow2.f32 %v2151_v27 }
  0xef   :  { %v2630_v25 = vpop.eup %2629 }
  0xf0   :  { %231 = vrot.lane.b32.xlu0 %v2630_v25, %s2838_s29 }
  0xf1   :  { %v2632_v28 = vpop.eup %2631 }
  0xf2   :  { %v221_v29 = vadd.f32 1.0, %v2632_v28 }
  0xf4   :  { %226 = vrot.lane.b32.xlu0 %v143_v26, %s2839_s3  ;;  %2633 = vrcp.f32 %v221_v29 }
  0xfe   :  { %v2634_v30 = vpop.eup %2633 }
 0x162   :  { %v232_v31 = vpop.permute.xlu0 %231 }
 0x163   :  { %v234_v32 = vmul.f32 %v2634_v30, %v232_v31 }
 0x165   :  { %236 = vrot.lane.b32.xlu1 %v234_v32, %s2839_s3 }
 0x166   :  { %v227_v33 = vpop.permute.xlu0 %226 }
 0x167   :  { %v229_v34 = vmul.f32 %v2634_v30, %v227_v33 }
 0x1d7   :  { %v237_v35 = vpop.permute.xlu1 %236 }
 0x1d8   :  { %v239_v36 = vadd.f32 %v237_v35, %v229_v34 }
 0x1da   :  { %2635 = vtanh.f32 %v239_v36  ;;  %v333_v52 = vrot.slane %v239_v36, 6 }
 0x1e4   :  { %v2636_v37 = vpop.eup %2635 }
 0x1e5   :  { %242 = vrot.lane.b32.xlu1 %v2636_v37, %s2838_s29 }
 0x257   :  { %v243_v38 = vpop.permute.xlu1 %242 }
 0x258   :  { %v2992_v39 = vmul.f32 %v2634_v30, %v243_v38 }
 0x25a   :  { %247 = vrot.lane.b32.xlu0 %v2992_v39, %s2839_s3 }
 0x2cc   :  { %v248_v40 = vpop.permute.xlu0 %247 }
 0x2cd   :  { %2319 = vmatmul.mubr.msk.f32.vlgmr.msra.gmra.mrb[2].mxu0 %vm60_vm0, %v248_v40 }
 0x2ce   :  { %2525 = vmatpush3.bf16.msra.mxu0 %v2936_v8  ;;  %2340 = vmatprep.mubr.msk.f32.mxu0 %vm2836_vm1, %v2837_v13 }
 0x2cf   :  { %2526 = vmatprep.subr.bf16.mxu0 %v2835_v4 }
 0x2d2   :  { %2528 = vmatpush3.bf16.msra.mxu0 %v2951_v14 }
 0x2d3   :  { %2535 = vmatprep.subr.bf16.mxu0 %v2835_v4 }
 0x3a0   :  { %v317_v41 = vpop.f32.mrb[2].mxu0 }
 0x3a1   :  { %v322_v42 = vrot.slane %v317_v41, 6  ;;  %v2320_v43 = vpop.f32.mrb[3].mxu0 }
 0x3a3   :  { %v324_v44 = vadd.f32 %v322_v42, %v2982_v23 }
 0x3a5   :  { %2637 = vtanh.f32 %v324_v44  ;;  %v2153_v46 = vmul.f32 -1.442695, %v324_v44 }
 0x3a7   :  { %2639 = vpow2.f32 %v2153_v46 }
 0x3af   :  { %v2638_v45 = vpop.eup %2637 }
 0x3b0   :  { %337 = vrot.lane.b32.xlu1 %v2638_v45, %s2838_s29 }
 0x3b1   :  { %v2640_v47 = vpop.eup %2639 }
 0x3b2   :  { %v328_v48 = vadd.f32 1.0, %v2640_v47 }
 0x3b4   :  { %2641 = vrcp.f32 %v328_v48 }
 0x3be   :  { %v2642_v49 = vpop.eup %2641 }
 0x3bf   :  { %v335_v53 = vmul.f32 %v2642_v49, %v333_v52 }
 0x422   :  { %v338_v50 = vpop.permute.xlu1 %337 }
 0x423   :  { %v340_v51 = vmul.f32 %v2642_v49, %v338_v50 }
 0x425   :  { %342 = vrot.lane.b32.xlu0 %v340_v51, %s2839_s3 }
 0x497   :  { %v343_v54 = vpop.permute.xlu0 %342 }
 0x498   :  { %v345_v55 = vadd.f32 %v343_v54, %v335_v53 }
 0x49a   :  { %2643 = vtanh.f32 %v345_v55  ;;  %v440_v10 = vrot.slane %v345_v55, 6 }
 0x4a4   :  { %v2644_v56 = vpop.eup %2643 }
 0x4a5   :  { %348 = vrot.lane.b32.xlu1 %v2644_v56, %s2838_s29 }
 0x517   :  { %v349_v57 = vpop.permute.xlu1 %348 }
 0x518   :  { %v351_v58 = vmul.f32 %v2642_v49, %v349_v57 }
 0x51a   :  { %v353_v59 = vrot.slane %v351_v58, 2  ;;  %v991_v19 = vsel %vm990_vm2, %v2992_v39, %v351_v58 }
 0x51c   :  { %354 = vrot.lane.b32.xlu0 %v353_v59, %s2839_s3 }
 0x58e   :  { %v355_v60 = vpop.permute.xlu0 %354 }
 0x58f   :  { %2330 = vmatmul.mubr.msk.f32.vlgmr.msra.gmra.mrb[2].mxu1 %vm60_vm0, %v355_v60 }
 0x590   :  { %2531 = vmatpush3.bf16.msra.mxu1 %v2936_v8  ;;  %2351 = vmatprep.mubr.msk.f32.mxu1 %vm2836_vm1, %v2837_v13 }
 0x591   :  { %2532 = vmatprep.subr.bf16.mxu1 %v2835_v4 }
 0x594   :  { %2534 = vmatpush3.bf16.msra.mxu1 %v2951_v14 }
 0x595   :  { %2541 = vmatprep.subr.bf16.mxu1 %v2835_v4 }
 0x662   :  { %v424_v61 = vpop.f32.mrb[2].mxu1 }
 0x663   :  { %v429_v62 = vrot.slane %v424_v61, 4  ;;  %v2331_v63 = vpop.f32.mrb[3].mxu1 }
 0x665   :  { %v431_v0 = vadd.f32 %v429_v62, %v2982_v23 }
 0x667   :  { %2645 = vtanh.f32 %v431_v0  ;;  %v2155_v2 = vmul.f32 -1.442695, %v431_v0 }
 0x669   :  { %2647 = vpow2.f32 %v2155_v2 }
 0x671   :  { %v2646_v1 = vpop.eup %2645 }
 0x672   :  { %444 = vrot.lane.b32.xlu1 %v2646_v1, %s2838_s29 }
 0x673   :  { %v2648_v3 = vpop.eup %2647 }
 0x674   :  { %v435_v5 = vadd.f32 1.0, %v2648_v3 }
 0x676   :  { %2649 = vrcp.f32 %v435_v5 }
 0x680   :  { %v2650_v6 = vpop.eup %2649 }
 0x681   :  { %v442_v11 = vmul.f32 %v2650_v6, %v440_v10 }
 0x6e4   :  { %v445_v7 = vpop.permute.xlu1 %444 }
 0x6e5   :  { %v447_v9 = vmul.f32 %v2650_v6, %v445_v7 }
 0x6e7   :  { %449 = vrot.lane.b32.xlu0 %v447_v9, %s2839_s3 }
 0x759   :  { %v450_v12 = vpop.permute.xlu0 %449 }
 0x75a   :  { %v452_v15 = vadd.f32 %v450_v12, %v442_v11 }
 0x75c   :  { %2651 = vtanh.f32 %v452_v15  ;;  %v547_v36 = vrot.slane %v452_v15, 6 }
 0x766   :  { %v2652_v16 = vpop.eup %2651 }
 0x767   :  { %455 = vrot.lane.b32.xlu1 %v2652_v16, %s2838_s29 }
 0x7d9   :  { %v456_v17 = vpop.permute.xlu1 %455 }
 0x7da   :  { %v458_v18 = vmul.f32 %v2650_v6, %v456_v17 }
 0x7dc   :  { %v460_v21 = vrot.slane %v458_v18, 4  ;;  %v993_v22 = vsel %vm992_vm3, %v991_v19, %v458_v18 }
 0x7de   :  { %461 = vrot.lane.b32.xlu0 %v460_v21, %s2839_s3 }
 0x850   :  { %v462_v24 = vpop.permute.xlu0 %461 }
 0x851   :  { %2341 = vmatmul.mubr.msk.f32.vlgmr.msra.gmra.mrb[4].mxu0 %vm60_vm0, %v462_v24 }
 0x852   :  { %2537 = vmatpush3.bf16.msra.mxu0 %v2936_v8  ;;  %2362 = vmatprep.mubr.msk.f32.mxu0 %vm2836_vm1, %v2837_v13 }
 0x853   :  { %2538 = vmatprep.subr.bf16.mxu0 %v2835_v4 }
 0x856   :  { %2540 = vmatpush3.bf16.msra.mxu0 %v2951_v14 }
 0x857   :  { %2547 = vmatprep.subr.bf16.mxu0 %v2835_v4 }
 0x924   :  { %v531_v25 = vpop.f32.mrb[4].mxu0 }
 0x925   :  { %v536_v26 = vrot.slane %v531_v25, 2  ;;  %v2342_v27 = vpop.f32.mrb[5].mxu0 }
 0x927   :  { %v538_v28 = vadd.f32 %v536_v26, %v2982_v23 }
 0x929   :  { %2653 = vtanh.f32 %v538_v28  ;;  %v2157_v30 = vmul.f32 -1.442695, %v538_v28 }
 0x92b   :  { %2655 = vpow2.f32 %v2157_v30 }
 0x933   :  { %v2654_v29 = vpop.eup %2653 }
 0x934   :  { %551 = vrot.lane.b32.xlu1 %v2654_v29, %s2838_s29 }
 0x935   :  { %v2656_v31 = vpop.eup %2655 }
 0x936   :  { %v542_v32 = vadd.f32 1.0, %v2656_v31 }
 0x938   :  { %2657 = vrcp.f32 %v542_v32 }
 0x942   :  { %v2658_v33 = vpop.eup %2657 }
 0x943   :  { %v549_v37 = vmul.f32 %v2658_v33, %v547_v36 }
 0x9a6   :  { %v552_v34 = vpop.permute.xlu1 %551 }
 0x9a7   :  { %v554_v35 = vmul.f32 %v2658_v33, %v552_v34 }
 0x9a9   :  { %556 = vrot.lane.b32.xlu0 %v554_v35, %s2839_s3 }
 0xa1b   :  { %v557_v38 = vpop.permute.xlu0 %556 }
 0xa1c   :  { %v559_v39 = vadd.f32 %v557_v38, %v549_v37 }
 0xa1e   :  { %2659 = vtanh.f32 %v559_v39  ;;  %v651_v55 = vrot.slane %v559_v39, 6 }
 0xa28   :  { %v2660_v23 = vpop.eup %2659 }
 0xa29   :  { %562 = vrot.lane.b32.xlu1 %v2660_v23, %s2838_s29 }
 0xa9b   :  { %v563_v40 = vpop.permute.xlu1 %562 }
 0xa9c   :  { %v565_v41 = vmul.f32 %v2658_v33, %v563_v40 }
 0xa9e   :  { %v567_v42 = vrot.slane %v565_v41, 6  ;;  %v3035_v43 = vsel %vm994_vm4, %v993_v22, %v565_v41 }
 0xaa0   :  { %568 = vrot.lane.b32.xlu0 %v567_v42, %s2839_s3 }
 0xb12   :  { %v569_v44 = vpop.permute.xlu0 %568 }
 0xb13   :  { %2352 = vmatmul.mubr.msk.f32.vlgmr.msra.gmra.mrb[4].mxu1 %vm60_vm0, %v569_v44 }
 0xb14   :  { %2543 = vmatpush3.bf16.msra.mxu1 %v2936_v8  ;;  %2373 = vmatprep.mubr.msk.f32.mxu1 %vm2836_vm1, %v2837_v13 }
 0xb15   :  { %2544 = vmatprep.subr.bf16.mxu1 %v2835_v4 }
 0xb18   :  { %2546 = vmatpush3.bf16.msra.mxu1 %v2951_v14 }
 0xbe6   :  { %v638_v45 = vpop.f32.mrb[4].mxu1 }
 0xbe7   :  { %v642_v46 = vadd.f32 %v638_v45, %v2980_v20  ;;  %v2353_v47 = vpop.f32.mrb[5].mxu1 }
 0xbe9   :  { %2661 = vtanh.f32 %v642_v46  ;;  %v2159_v49 = vmul.f32 -1.442695, %v642_v46 }
 0xbeb   :  { %2663 = vpow2.f32 %v2159_v49 }
 0xbf3   :  { %v2662_v48 = vpop.eup %2661 }
 0xbf4   :  { %655 = vrot.lane.b32.xlu1 %v2662_v48, %s2838_s29 }
 0xbf5   :  { %v2664_v50 = vpop.eup %2663 }
 0xbf6   :  { %v646_v51 = vadd.f32 1.0, %v2664_v50 }
 0xbf8   :  { %2665 = vrcp.f32 %v646_v51 }
 0xc02   :  { %v2666_v52 = vpop.eup %2665 }
 0xc03   :  { %v653_v56 = vmul.f32 %v2666_v52, %v651_v55 }
 0xc66   :  { %v656_v53 = vpop.permute.xlu1 %655 }
 0xc67   :  { %v658_v54 = vmul.f32 %v2666_v52, %v656_v53 }
 0xc69   :  { %660 = vrot.lane.b32.xlu0 %v658_v54, %s2839_s3 }
 0xcdb   :  { %v661_v57 = vpop.permute.xlu0 %660 }
 0xcdc   :  { %v663_v58 = vadd.f32 %v661_v57, %v653_v56 }
 0xcde   :  { %2667 = vtanh.f32 %v663_v58 }
 0xce8   :  { %v2668_v59 = vpop.eup %2667 }
 0xce9   :  { %666 = vrot.lane.b32.xlu1 %v2668_v59, %s2838_s29 }
 0xd5b   :  { %v667_v60 = vpop.permute.xlu1 %666 }
 0xd5c   :  { %v3048_v61 = vmul.f32 %v2666_v52, %v667_v60  ;;  %v1010_v60 = vld [vmem:[%s3335_s4] sm:$0xff] }
 0xd5e   :  { %671 = vrot.lane.b32.xlu0 %v3048_v61, %s2839_s3 }
 0xdd0   :  { %v672_v62 = vpop.permute.xlu0 %671 }
 0xdd1   :  { %2363 = vmatmul.mubr.msk.f32.vlgmr.msra.gmra.mrb[6].mxu0 %vm60_vm0, %v672_v62 }
 0xdd2   :  { %2549 = vmatpush3.bf16.msra.mxu0 %v2936_v8  ;;  %2384 = vmatprep.mubr.msk.f32.mxu0 %vm2836_vm1, %v2837_v13 }
 0xdd3   :  { %2550 = vmatprep.subr.bf16.mxu0 %v2835_v4 }
 0xdd6   :  { %2552 = vmatpush3.bf16.msra.mxu0 %v2951_v14  ;;  %v757_v14 = vrot.slane %v663_v58, 6 }
 0xdd7   :  { %2561 = vmatprep.subr.bf16.mxu0 %v2835_v4 }
 0xea4   :  { %v741_v63 = vpop.f32.mrb[6].mxu0 }
 0xea5   :  { %v746_v0 = vrot.slane %v741_v63, 6  ;;  %v2364_v1 = vpop.f32.mrb[7].mxu0  ;;  %v1015_v63 = vld [vmem:[%s3336_s5 + $0x8] sm:$0xff] }
 0xea6   :  { %v1013_v1 = vld [vmem:[%s3335_s4 + $0x18] sm:$0xff] }
 0xea7   :  { %v748_v2 = vadd.f32 %v746_v0, %v2980_v20  ;;  %v1012_v0 = vld [vmem:[%s3335_s4 + $0x10] sm:$0xff] }
 0xea9   :  { %2669 = vtanh.f32 %v748_v2  ;;  %v2161_v5 = vmul.f32 -1.442695, %v748_v2 }
 0xeab   :  { %2671 = vpow2.f32 %v2161_v5  ;;  %v1016_v5 = vld [vmem:[%s3336_s5 + $0x10] sm:$0xff] }
 0xeb3   :  { %v2670_v3 = vpop.eup %2669 }
 0xeb4   :  { %761 = vrot.lane.b32.xlu1 %v2670_v3, %s2838_s29  ;;  %v2557_v3 = vpack.c.bf16 %v1013_v1, %v1012_v0 }
 0xeb5   :  { %v2672_v8 = vpop.eup %2671 }
 0xeb6   :  { %v752_v6 = vadd.f32 1.0, %v2672_v8  ;;  %v1017_v8 = vld [vmem:[%s3336_s5 + $0x18] sm:$0xff] }
 0xeb8   :  { %2673 = vrcp.f32 %v752_v6  ;;  %v3112_v6 = vpack.c.bf16 %v1017_v8, %v1016_v5 }
 0xec2   :  { %v2674_v7 = vpop.eup %2673 }
 0xec3   :  { %v759_v11 = vmul.f32 %v2674_v7, %v757_v14 }
 0xf26   :  { %v762_v9 = vpop.permute.xlu1 %761 }
 0xf27   :  { %v764_v10 = vmul.f32 %v2674_v7, %v762_v9  ;;  %v2169_v9 = vld [vmem:[%s3338_s7 + $0x2] sm:$0x3] }
 0xf29   :  { %766 = vrot.lane.b32.xlu0 %v764_v10, %s2839_s3 }
 0xf9b   :  { %v767_v12 = vpop.permute.xlu0 %766 }
 0xf9c   :  { %v769_v15 = vadd.f32 %v767_v12, %v759_v11  ;;  %v2170_v12 = vld [vmem:[%s3339_s8 + $0x2] sm:$0x3] }
 0xf9e   :  { %2675 = vtanh.f32 %v769_v15  ;;  %v864_v34 = vrot.slane %v769_v15, 6 }
 0xfa8   :  { %v2676_v16 = vpop.eup %2675 }
 0xfa9   :  { %772 = vrot.lane.b32.xlu1 %v2676_v16, %s2838_s29 }
0x101b   :  { %v773_v17 = vpop.permute.xlu1 %772 }
0x101c   :  { %v775_v18 = vmul.f32 %v2674_v7, %v773_v17 }
0x101e   :  { %v777_v19 = vrot.slane %v775_v18, 2  ;;  %v996_v40 = vsel %vm990_vm2, %v3048_v61, %v775_v18  ;;  %v1011_v61 = vld [vmem:[%s3335_s4 + $0x8] sm:$0xff]  ;;  %v2166_v18 = vld [vmem:[%s3337_s6] ss:$0 sm:$0xff] }
0x101f   :  { %v2553_v62 = vpack.c.bf16 %v1011_v61, %v1010_v60 }
0x1020   :  { %778 = vrot.lane.b32.xlu0 %v777_v19, %s2839_s3 }
0x1021   :  { %2554 = vmatprep.subr.bf16.mxu1 %v2553_v62 }
0x1092   :  { %v779_v21 = vpop.permute.xlu0 %778 }
0x1093   :  { %2374 = vmatmul.mubr.msk.f32.vlgmr.msra.gmra.mrb[6].mxu1 %vm60_vm0, %v779_v21 }
0x1094   :  { %2556 = vmatpush3.bf16.msra.mxu1 %v2553_v62 }
0x1095   :  { %2558 = vmatprep.subr.bf16.mxu1 %v2557_v3 }
0x1098   :  { %2560 = vmatpush3.bf16.msra.mxu1 %v2557_v3 }
0x1099   :  { %2567 = vmatprep.subr.bf16.mxu1 %v2835_v4 }
0x1166   :  { %v848_v22 = vpop.f32.mrb[6].mxu1 }
0x1167   :  { %v853_v24 = vrot.slane %v848_v22, 4  ;;  %v2375_v25 = vpop.f32.mrb[7].mxu1 }
0x1169   :  { %v855_v26 = vadd.f32 %v853_v24, %v2980_v20 }
0x116b   :  { %2677 = vtanh.f32 %v855_v26  ;;  %v2163_v28 = vmul.f32 -1.442695, %v855_v26 }
0x116d   :  { %2679 = vpow2.f32 %v2163_v28 }
0x1175   :  { %v2678_v27 = vpop.eup %2677 }
0x1176   :  { %868 = vrot.lane.b32.xlu1 %v2678_v27, %s2838_s29 }
0x1177   :  { %v2680_v29 = vpop.eup %2679 }
0x1178   :  { %v859_v30 = vadd.f32 1.0, %v2680_v29 }
0x117a   :  { %2681 = vrcp.f32 %v859_v30 }
0x1184   :  { %v2682_v31 = vpop.eup %2681 }
0x1185   :  { %v866_v35 = vmul.f32 %v2682_v31, %v864_v34 }
0x11e8   :  { %v869_v32 = vpop.permute.xlu1 %868 }
0x11e9   :  { %v871_v33 = vmul.f32 %v2682_v31, %v869_v32 }
0x11eb   :  { %873 = vrot.lane.b32.xlu0 %v871_v33, %s2839_s3 }
0x125d   :  { %v874_v36 = vpop.permute.xlu0 %873 }
0x125e   :  { %v876_v37 = vadd.f32 %v874_v36, %v866_v35 }
0x1260   :  { %2683 = vtanh.f32 %v876_v37  ;;  %v971_v56 = vrot.slane %v876_v37, 6 }
0x126a   :  { %v2684_v38 = vpop.eup %2683 }
0x126b   :  { %879 = vrot.lane.b32.xlu1 %v2684_v38, %s2838_s29 }
0x12dd   :  { %v880_v39 = vpop.permute.xlu1 %879 }
0x12de   :  { %v882_v23 = vmul.f32 %v2682_v31, %v880_v39 }
0x12e0   :  { %v884_v41 = vrot.slane %v882_v23, 4  ;;  %v997_v42 = vsel %vm992_vm3, %v996_v40, %v882_v23 }
0x12e2   :  { %885 = vrot.lane.b32.xlu0 %v884_v41, %s2839_s3 }
0x1354   :  { %v886_v44 = vpop.permute.xlu0 %885 }
0x1355   :  { %2385 = vmatmul.mubr.msk.f32.vlgmr.msra.gmra.mrb[8].mxu0 %vm60_vm0, %v886_v44 }
0x1356   :  { %2406 = vmatprep.mubr.msk.f32.mxu0 %vm2836_vm1, %v2837_v13 }
0x1428   :  { %v955_v45 = vpop.f32.mrb[8].mxu0 }
0x1429   :  { %v960_v46 = vrot.slane %v955_v45, 2  ;;  %v2386_v47 = vpop.f32.mrb[9].mxu0 }
0x142b   :  { %v962_v48 = vadd.f32 %v960_v46, %v2980_v20 }
0x142d   :  { %2685 = vtanh.f32 %v962_v48  ;;  %v2165_v50 = vmul.f32 -1.442695, %v962_v48 }
0x142f   :  { %2687 = vpow2.f32 %v2165_v50 }
0x1437   :  { %v2686_v49 = vpop.eup %2685 }
0x1438   :  { %975 = vrot.lane.b32.xlu1 %v2686_v49, %s2838_s29 }
0x1439   :  { %v2688_v51 = vpop.eup %2687 }
0x143a   :  { %v966_v52 = vadd.f32 1.0, %v2688_v51 }
0x143c   :  { %2689 = vrcp.f32 %v966_v52 }
0x1446   :  { %v2690_v53 = vpop.eup %2689 }
0x1447   :  { %v973_v57 = vmul.f32 %v2690_v53, %v971_v56 }
0x14aa   :  { %v976_v54 = vpop.permute.xlu1 %975 }
0x14ab   :  { %v978_v55 = vmul.f32 %v2690_v53, %v976_v54 }
0x14ad   :  { %980 = vrot.lane.b32.xlu0 %v978_v55, %s2839_s3 }
0x14b1   :  { %1027 = vrot.lane.b32.xlu0 %v3035_v43, %s2839_s3  ;;  %v1014_v43 = vld [vmem:[%s3336_s5] sm:$0xff] }
0x14b2   :  { %v3103_v2 = vpack.c.bf16 %v1015_v63, %v1014_v43 }
0x14b4   :  { %2563 = vmatpush3.bf16.msra.mxu0 %v3103_v2 }
0x14b5   :  { %2564 = vmatprep.subr.bf16.mxu0 %v2835_v4 }
0x14b8   :  { %2566 = vmatpush3.bf16.msra.mxu0 %v3112_v6 }
0x14b9   :  { %2573 = vmatprep.subr.bf16.mxu0 %v2835_v4 }
0x14bb   :  { %2407 = vmatmul.mubr.msk.f32.vlgmr.msra.gmra.mrb[10].mxu0 %vm60_vm0, %v2169_v9 }
0x14bc   :  { %2575 = vmatpush3.bf16.msra.mxu0 %v3103_v2  ;;  %2428 = vmatprep.mubr.msk.f32.mxu0 %vm2836_vm1, %v2837_v13 }
0x14bd   :  { %2576 = vmatprep.subr.bf16.mxu0 %v2835_v4 }
0x14c0   :  { %2578 = vmatpush3.bf16.msra.mxu0 %v3112_v6 }
0x14c1   :  { %2585 = vmatprep.subr.bf16.mxu0 %v2835_v4 }
0x151f   :  { %v981_v20 = vpop.permute.xlu0 %980 }
0x1520   :  { %v3081_v58 = vadd.f32 %v981_v20, %v973_v57 }
0x1522   :  { %2691 = vtanh.f32 %v3081_v58 }
0x1523   :  { %v1028_v59 = vpop.permute.xlu0 %1027 }
0x1524   :  { %2395 = vmatprep.mubr.msk.f32.mxu1 %vm60_vm0, %v1028_v59 }
0x152c   :  { %v2692_v7 = vpop.eup %2691 }
0x152d   :  { %986 = vrot.lane.b32.xlu1 %v2692_v7, %s2838_s29 }
0x158e   :  { %v1183_v16 = vpop.f32.mrb[10].mxu0 }
0x158f   :  { %v2408_v17 = vpop.f32.mrb[11].mxu0 }
0x159f   :  { %v987_v10 = vpop.permute.xlu1 %986 }
0x15a0   :  { %v3129_v14 = vmul.f32 %v2690_v53, %v987_v10 }
0x15a2   :  { %v998_v11 = vsel %vm994_vm4, %v997_v42, %v3129_v14 }
0x15a3   :  { %1029 = vrot.lane.b32.xlu1 %v998_v11, %s2839_s3 }
0x15a7   :  { %1196 = vrot.lane.b32.xlu1 %v2170_v12, %s2839_s3 }
0x1615   :  { %v1030_v15 = vpop.permute.xlu1 %1029 }
0x1616   :  { %2396 = vmatmul.mubr.msk.f32.vlgmr.msra.gmra.mrb[8].mxu1 %vm60_vm0, %v1030_v15 }
0x1617   :  { %2569 = vmatpush3.bf16.msra.mxu1 %v3103_v2  ;;  %2417 = vmatprep.mubr.msk.f32.mxu1 %vm2836_vm1, %v2837_v13 }
0x1618   :  { %2570 = vmatprep.subr.bf16.mxu1 %v2835_v4 }
0x1619   :  { %v1197_v33 = vpop.permute.xlu1 %1196 }
0x161b   :  { %2572 = vmatpush3.bf16.msra.mxu1 %v3112_v6 }
0x161c   :  { %2579 = vmatprep.subr.bf16.mxu1 %v2835_v4 }
0x16e9   :  { %v2397_v19 = vpop.f32.mrb[8].mxu1 }
0x16ea   :  { %v3148_v21 = vadd.f32 %v2397_v19, %v2166_v18  ;;  %v1101_v22 = vpop.f32.mrb[9].mxu1 }
0x16eb   :  { %v3150_v24 = vadd.f32 %v2166_v18, %v1101_v22 }
0x16ed   :  { %v1187_v25 = vadd.f32 %v1183_v16, %v3150_v24 }
0x16ef   :  { %2693 = vtanh.f32 %v1187_v25  ;;  %v2172_v27 = vmul.f32 -1.442695, %v1187_v25 }
0x16f1   :  { %2695 = vpow2.f32 %v2172_v27 }
0x16f9   :  { %v2694_v26 = vpop.eup %2693 }
0x16fa   :  { %1201 = vrot.lane.b32.xlu0 %v2694_v26, %s2838_s29 }
0x16fb   :  { %v2696_v28 = vpop.eup %2695 }
0x16fc   :  { %v1191_v29 = vadd.f32 1.0, %v2696_v28 }
0x16fe   :  { %2697 = vrcp.f32 %v1191_v29 }
0x1708   :  { %v2698_v30 = vpop.eup %2697 }
0x1709   :  { %v1199_v34 = vmul.f32 %v2698_v30, %v1197_v33 }
0x176c   :  { %v1202_v31 = vpop.permute.xlu0 %1201 }
0x176d   :  { %v1204_v32 = vmul.f32 %v2698_v30, %v1202_v31 }
0x176f   :  { %1206 = vrot.lane.b32.xlu0 %v1204_v32, %s2839_s3 }
0x17e1   :  { %v1207_v35 = vpop.permute.xlu0 %1206 }
0x17e2   :  { %v1209_v36 = vadd.f32 %v1207_v35, %v1199_v34 }
0x17e4   :  { %2699 = vtanh.f32 %v1209_v36  ;;  %v1303_v52 = vrot.slane %v1209_v36, 6 }
0x17ee   :  { %v2700_v37 = vpop.eup %2699 }
0x17ef   :  { %1212 = vrot.lane.b32.xlu1 %v2700_v37, %s2838_s29 }
0x1861   :  { %v1213_v38 = vpop.permute.xlu1 %1212 }
0x1862   :  { %v3156_v39 = vmul.f32 %v2698_v30, %v1213_v38 }
0x1864   :  { %1217 = vrot.lane.b32.xlu0 %v3156_v39, %s2839_s3 }
0x18d6   :  { %v1218_v23 = vpop.permute.xlu0 %1217 }
0x18d7   :  { %2418 = vmatmul.mubr.msk.f32.vlgmr.msra.gmra.mrb[10].mxu1 %vm60_vm0, %v1218_v23 }
0x18d8   :  { %2581 = vmatpush3.bf16.msra.mxu1 %v3103_v2  ;;  %2439 = vmatprep.mubr.msk.f32.mxu1 %vm2836_vm1, %v2837_v13 }
0x18d9   :  { %2582 = vmatprep.subr.bf16.mxu1 %v2835_v4 }
0x18dc   :  { %2584 = vmatpush3.bf16.msra.mxu1 %v3112_v6 }
0x18dd   :  { %2591 = vmatprep.subr.bf16.mxu1 %v2835_v4 }
0x19aa   :  { %v1287_v40 = vpop.f32.mrb[10].mxu1 }
0x19ab   :  { %v1292_v41 = vrot.slane %v1287_v40, 6  ;;  %v2419_v42 = vpop.f32.mrb[11].mxu1 }
0x19ad   :  { %v1294_v44 = vadd.f32 %v1292_v41, %v3150_v24 }
0x19af   :  { %2701 = vtanh.f32 %v1294_v44  ;;  %v2174_v46 = vmul.f32 -1.442695, %v1294_v44 }
0x19b1   :  { %2703 = vpow2.f32 %v2174_v46 }
0x19b9   :  { %v2702_v45 = vpop.eup %2701 }
0x19ba   :  { %1307 = vrot.lane.b32.xlu1 %v2702_v45, %s2838_s29 }
0x19bb   :  { %v2704_v47 = vpop.eup %2703 }
0x19bc   :  { %v1298_v48 = vadd.f32 1.0, %v2704_v47 }
0x19be   :  { %2705 = vrcp.f32 %v1298_v48 }
0x19c8   :  { %v2706_v49 = vpop.eup %2705 }
0x19c9   :  { %v1305_v53 = vmul.f32 %v2706_v49, %v1303_v52 }
0x1a2c   :  { %v1308_v50 = vpop.permute.xlu1 %1307 }
0x1a2d   :  { %v1310_v51 = vmul.f32 %v2706_v49, %v1308_v50 }
0x1a2f   :  { %1312 = vrot.lane.b32.xlu0 %v1310_v51, %s2839_s3 }
0x1aa1   :  { %v1313_v54 = vpop.permute.xlu0 %1312 }
0x1aa2   :  { %v1315_v55 = vadd.f32 %v1313_v54, %v1305_v53 }
0x1aa4   :  { %2707 = vtanh.f32 %v1315_v55  ;;  %v1410_v10 = vrot.slane %v1315_v55, 6 }
0x1aae   :  { %v2708_v56 = vpop.eup %2707 }
0x1aaf   :  { %1318 = vrot.lane.b32.xlu1 %v2708_v56, %s2838_s29 }
0x1b21   :  { %v1319_v57 = vpop.permute.xlu1 %1318 }
0x1b22   :  { %v1321_v20 = vmul.f32 %v2706_v49, %v1319_v57 }
0x1b24   :  { %v1323_v59 = vrot.slane %v1321_v20, 2  ;;  %v1960_v19 = vsel %vm990_vm2, %v3156_v39, %v1321_v20 }
0x1b26   :  { %1324 = vrot.lane.b32.xlu0 %v1323_v59, %s2839_s3 }
0x1b98   :  { %v1325_v60 = vpop.permute.xlu0 %1324 }
0x1b99   :  { %2429 = vmatmul.mubr.msk.f32.vlgmr.msra.gmra.mrb[12].mxu0 %vm60_vm0, %v1325_v60 }
0x1b9a   :  { %2587 = vmatpush3.bf16.msra.mxu0 %v3103_v2  ;;  %2450 = vmatprep.mubr.msk.f32.mxu0 %vm2836_vm1, %v2837_v13 }
0x1b9b   :  { %2588 = vmatprep.subr.bf16.mxu0 %v2835_v4 }
0x1b9e   :  { %2590 = vmatpush3.bf16.msra.mxu0 %v3112_v6 }
0x1b9f   :  { %2597 = vmatprep.subr.bf16.mxu0 %v2835_v4 }
0x1c6c   :  { %v1394_v61 = vpop.f32.mrb[12].mxu0 }
0x1c6d   :  { %v1399_v43 = vrot.slane %v1394_v61, 4  ;;  %v2430_v62 = vpop.f32.mrb[13].mxu0 }
0x1c6f   :  { %v1401_v63 = vadd.f32 %v1399_v43, %v3150_v24 }
0x1c71   :  { %2709 = vtanh.f32 %v1401_v63  ;;  %v2176_v1 = vmul.f32 -1.442695, %v1401_v63 }
0x1c73   :  { %2711 = vpow2.f32 %v2176_v1 }
0x1c7b   :  { %v2710_v0 = vpop.eup %2709 }
0x1c7c   :  { %1414 = vrot.lane.b32.xlu1 %v2710_v0, %s2838_s29 }
0x1c7d   :  { %v2712_v3 = vpop.eup %2711 }
0x1c7e   :  { %v1405_v5 = vadd.f32 1.0, %v2712_v3 }
0x1c80   :  { %2713 = vrcp.f32 %v1405_v5 }
0x1c8a   :  { %v2714_v8 = vpop.eup %2713 }
0x1c8b   :  { %v1412_v11 = vmul.f32 %v2714_v8, %v1410_v10 }
0x1cee   :  { %v1415_v7 = vpop.permute.xlu1 %1414 }
0x1cef   :  { %v1417_v9 = vmul.f32 %v2714_v8, %v1415_v7 }
0x1cf1   :  { %1419 = vrot.lane.b32.xlu0 %v1417_v9, %s2839_s3 }
0x1d63   :  { %v1420_v12 = vpop.permute.xlu0 %1419 }
0x1d64   :  { %v1422_v15 = vadd.f32 %v1420_v12, %v1412_v11 }
0x1d66   :  { %2715 = vtanh.f32 %v1422_v15  ;;  %v1517_v38 = vrot.slane %v1422_v15, 6 }
0x1d70   :  { %v2716_v16 = vpop.eup %2715 }
0x1d71   :  { %1425 = vrot.lane.b32.xlu1 %v2716_v16, %s2838_s29 }
0x1de3   :  { %v1426_v17 = vpop.permute.xlu1 %1425 }
0x1de4   :  { %v1428_v18 = vmul.f32 %v2714_v8, %v1426_v17 }
0x1de6   :  { %v1430_v22 = vrot.slane %v1428_v18, 4  ;;  %v1961_v25 = vsel %vm992_vm3, %v1960_v19, %v1428_v18 }
0x1de8   :  { %1431 = vrot.lane.b32.xlu0 %v1430_v22, %s2839_s3 }
0x1e5a   :  { %v1432_v26 = vpop.permute.xlu0 %1431 }
0x1e5b   :  { %2440 = vmatmul.mubr.msk.f32.vlgmr.msra.gmra.mrb[12].mxu1 %vm60_vm0, %v1432_v26 }
0x1e5c   :  { %2593 = vmatpush3.bf16.msra.mxu1 %v3103_v2  ;;  %2461 = vmatprep.mubr.msk.f32.mxu1 %vm2836_vm1, %v2837_v13 }
0x1e5d   :  { %2594 = vmatprep.subr.bf16.mxu1 %v2835_v4 }
0x1e60   :  { %2596 = vmatpush3.bf16.msra.mxu1 %v3112_v6 }
0x1e61   :  { %2603 = vmatprep.subr.bf16.mxu1 %v2835_v4 }
0x1f2e   :  { %v1501_v27 = vpop.f32.mrb[12].mxu1 }
0x1f2f   :  { %v1506_v28 = vrot.slane %v1501_v27, 2  ;;  %v2441_v29 = vpop.f32.mrb[13].mxu1 }
0x1f31   :  { %v1508_v30 = vadd.f32 %v1506_v28, %v3150_v24 }
0x1f33   :  { %2717 = vtanh.f32 %v1508_v30  ;;  %v2178_v32 = vmul.f32 -1.442695, %v1508_v30 }
0x1f35   :  { %2719 = vpow2.f32 %v2178_v32 }
0x1f3d   :  { %v2718_v31 = vpop.eup %2717 }
0x1f3e   :  { %1521 = vrot.lane.b32.xlu1 %v2718_v31, %s2838_s29 }
0x1f3f   :  { %v2720_v33 = vpop.eup %2719 }
0x1f40   :  { %v1512_v34 = vadd.f32 1.0, %v2720_v33 }
0x1f42   :  { %2721 = vrcp.f32 %v1512_v34 }
0x1f4c   :  { %v2722_v35 = vpop.eup %2721 }
0x1f4d   :  { %v1519_v39 = vmul.f32 %v2722_v35, %v1517_v38 }
0x1fb0   :  { %v1522_v36 = vpop.permute.xlu1 %1521 }
0x1fb1   :  { %v1524_v37 = vmul.f32 %v2722_v35, %v1522_v36 }
0x1fb3   :  { %1526 = vrot.lane.b32.xlu0 %v1524_v37, %s2839_s3 }
0x2025   :  { %v1527_v23 = vpop.permute.xlu0 %1526 }
0x2026   :  { %v1529_v40 = vadd.f32 %v1527_v23, %v1519_v39 }
0x2028   :  { %2723 = vtanh.f32 %v1529_v40  ;;  %v1621_v57 = vrot.slane %v1529_v40, 6 }
0x2032   :  { %v2724_v24 = vpop.eup %2723 }
0x2033   :  { %1532 = vrot.lane.b32.xlu1 %v2724_v24, %s2838_s29 }
0x20a5   :  { %v1533_v41 = vpop.permute.xlu1 %1532 }
0x20a6   :  { %v1535_v42 = vmul.f32 %v2722_v35, %v1533_v41 }
0x20a8   :  { %v1537_v44 = vrot.slane %v1535_v42, 6  ;;  %v3199_v45 = vsel %vm994_vm4, %v1961_v25, %v1535_v42 }
0x20aa   :  { %1538 = vrot.lane.b32.xlu0 %v1537_v44, %s2839_s3 }
0x211c   :  { %v1539_v46 = vpop.permute.xlu0 %1538 }
0x211d   :  { %2451 = vmatmul.mubr.msk.f32.vlgmr.msra.gmra.mrb[14].mxu0 %vm60_vm0, %v1539_v46 }
0x211e   :  { %2599 = vmatpush3.bf16.msra.mxu0 %v3103_v2  ;;  %2472 = vmatprep.mubr.msk.f32.mxu0 %vm2836_vm1, %v2837_v13 }
0x211f   :  { %2600 = vmatprep.subr.bf16.mxu0 %v2835_v4 }
0x2122   :  { %2602 = vmatpush3.bf16.msra.mxu0 %v3112_v6 }
0x21f0   :  { %v1608_v47 = vpop.f32.mrb[14].mxu0 }
0x21f1   :  { %v1612_v48 = vadd.f32 %v1608_v47, %v3148_v21  ;;  %v2452_v49 = vpop.f32.mrb[15].mxu0 }
0x21f3   :  { %2725 = vtanh.f32 %v1612_v48  ;;  %v2180_v51 = vmul.f32 -1.442695, %v1612_v48 }
0x21f5   :  { %2727 = vpow2.f32 %v2180_v51 }
0x21fd   :  { %v2726_v50 = vpop.eup %2725 }
0x21fe   :  { %1625 = vrot.lane.b32.xlu1 %v2726_v50, %s2838_s29 }
0x21ff   :  { %v2728_v52 = vpop.eup %2727 }
0x2200   :  { %v1616_v53 = vadd.f32 1.0, %v2728_v52 }
0x2202   :  { %2729 = vrcp.f32 %v1616_v53 }
0x220c   :  { %v2730_v54 = vpop.eup %2729 }
0x220d   :  { %v1623_v20 = vmul.f32 %v2730_v54, %v1621_v57 }
0x2270   :  { %v1626_v55 = vpop.permute.xlu1 %1625 }
0x2271   :  { %v1628_v56 = vmul.f32 %v2730_v54, %v1626_v55 }
0x2273   :  { %1630 = vrot.lane.b32.xlu0 %v1628_v56, %s2839_s3 }
0x22e5   :  { %v1631_v59 = vpop.permute.xlu0 %1630 }
0x22e6   :  { %v1633_v60 = vadd.f32 %v1631_v59, %v1623_v20 }
0x22e8   :  { %2731 = vtanh.f32 %v1633_v60 }
0x22f2   :  { %v2732_v61 = vpop.eup %2731 }
0x22f3   :  { %1636 = vrot.lane.b32.xlu1 %v2732_v61, %s2838_s29 }
0x2365   :  { %v1637_v43 = vpop.permute.xlu1 %1636 }
0x2366   :  { %v3212_v62 = vmul.f32 %v2730_v54, %v1637_v43  ;;  %v1978_v43 = vld [vmem:[%s3340_s9] sm:$0xff] }
0x2368   :  { %1641 = vrot.lane.b32.xlu0 %v3212_v62, %s2839_s3 }
0x23da   :  { %v1642_v63 = vpop.permute.xlu0 %1641 }
0x23db   :  { %2462 = vmatmul.mubr.msk.f32.vlgmr.msra.gmra.mrb[14].mxu1 %vm60_vm0, %v1642_v63  ;;  %v1980_v63 = vld [vmem:[%s3340_s9 + $0x10] sm:$0xff] }
0x23dc   :  { %2605 = vmatpush3.bf16.msra.mxu1 %v3103_v2  ;;  %2483 = vmatprep.mubr.msk.f32.mxu1 %vm2836_vm1, %v2837_v13 }
0x23dd   :  { %2606 = vmatprep.subr.bf16.mxu1 %v2835_v4  ;;  %v1727_v4 = vrot.slane %v1633_v60, 6 }
0x23e0   :  { %2608 = vmatpush3.bf16.msra.mxu1 %v3112_v6 }
0x24ae   :  { %v1711_v0 = vpop.f32.mrb[14].mxu1 }
0x24af   :  { %v1716_v1 = vrot.slane %v1711_v0, 6  ;;  %v2463_v3 = vpop.f32.mrb[15].mxu1  ;;  %v1981_v0 = vld [vmem:[%s3340_s9 + $0x18] sm:$0xff] }
0x24b1   :  { %v1718_v5 = vadd.f32 %v1716_v1, %v3148_v21  ;;  %v2613_v1 = vpack.c.bf16 %v1981_v0, %v1980_v63 }
0x24b3   :  { %2733 = vtanh.f32 %v1718_v5  ;;  %v2182_v7 = vmul.f32 -1.442695, %v1718_v5 }
0x24b5   :  { %2735 = vpow2.f32 %v2182_v7 }
0x24bd   :  { %v2734_v8 = vpop.eup %2733 }
0x24be   :  { %1731 = vrot.lane.b32.xlu1 %v2734_v8, %s2838_s29 }
0x24bf   :  { %v2736_v9 = vpop.eup %2735 }
0x24c0   :  { %v1722_v2 = vadd.f32 1.0, %v2736_v9 }
0x24c2   :  { %2737 = vrcp.f32 %v1722_v2  ;;  %v2187_v2 = vld [vmem:[%s3341_s10] ss:$0 sm:$0xff]  ;;  %s2841_s10 = smov [#allocation4]  }
0x24cc   :  { %v2738_v10 = vpop.eup %2737 }
0x24cd   :  { %v1729_v6 = vmul.f32 %v2738_v10, %v1727_v4 }
0x2530   :  { %v1732_v13 = vpop.permute.xlu1 %1731 }
0x2531   :  { %v1734_v11 = vmul.f32 %v2738_v10, %v1732_v13 }
0x2533   :  { %1736 = vrot.lane.b32.xlu0 %v1734_v11, %s2839_s3 }
0x25a5   :  { %v1737_v12 = vpop.permute.xlu0 %1736 }
0x25a6   :  { %v1739_v15 = vadd.f32 %v1737_v12, %v1729_v6 }
0x25a8   :  { %2739 = vtanh.f32 %v1739_v15  ;;  %v1834_v36 = vrot.slane %v1739_v15, 6 }
0x25b2   :  { %v2740_v16 = vpop.eup %2739 }
0x25b3   :  { %1742 = vrot.lane.b32.xlu1 %v2740_v16, %s2838_s29 }
0x2625   :  { %v1743_v17 = vpop.permute.xlu1 %1742 }
0x2626   :  { %v1745_v18 = vmul.f32 %v2738_v10, %v1743_v17 }
0x2628   :  { %v1747_v19 = vrot.slane %v1745_v18, 2  ;;  %v1963_v41 = vsel %vm990_vm2, %v3212_v62, %v1745_v18  ;;  %v1979_v62 = vld [vmem:[%s3340_s9 + $0x8] sm:$0xff]  ;;  %s2840_s9 = smov 96  }
0x262a   :  { %1748 = vrot.lane.b32.xlu0 %v1747_v19, %s2839_s3 }
0x269c   :  { %v1749_v22 = vpop.permute.xlu0 %1748 }
0x269d   :  { %2473 = vmatmul.mubr.msk.f32.vlgmr.msra.gmra.mrb[16].mxu0 %vm60_vm0, %v1749_v22 }
0x2770   :  { %v1818_v25 = vpop.f32.mrb[16].mxu0 }
0x2771   :  { %v1823_v26 = vrot.slane %v1818_v25, 4  ;;  %v2474_v27 = vpop.f32.mrb[17].mxu0 }
0x2773   :  { %v1825_v28 = vadd.f32 %v1823_v26, %v3148_v21 }
0x2775   :  { %2741 = vtanh.f32 %v1825_v28  ;;  %v2184_v30 = vmul.f32 -1.442695, %v1825_v28 }
0x2777   :  { %2743 = vpow2.f32 %v2184_v30 }
0x277f   :  { %v2742_v29 = vpop.eup %2741 }
0x2780   :  { %1838 = vrot.lane.b32.xlu1 %v2742_v29, %s2838_s29 }
0x2781   :  { %v2744_v31 = vpop.eup %2743 }
0x2782   :  { %v1829_v32 = vadd.f32 1.0, %v2744_v31 }
0x2784   :  { %2745 = vrcp.f32 %v1829_v32 }
0x278e   :  { %v2746_v33 = vpop.eup %2745 }
0x278f   :  { %v1836_v37 = vmul.f32 %v2746_v33, %v1834_v36 }
0x27f2   :  { %v1839_v34 = vpop.permute.xlu1 %1838 }
0x27f3   :  { %v1841_v35 = vmul.f32 %v2746_v33, %v1839_v34 }
0x27f5   :  { %1843 = vrot.lane.b32.xlu0 %v1841_v35, %s2839_s3 }
0x2867   :  { %v1844_v38 = vpop.permute.xlu0 %1843 }
0x2868   :  { %v1846_v39 = vadd.f32 %v1844_v38, %v1836_v37 }
0x286a   :  { %2747 = vtanh.f32 %v1846_v39  ;;  %v1941_v20 = vrot.slane %v1846_v39, 6 }
0x2874   :  { %v2748_v23 = vpop.eup %2747 }
0x2875   :  { %1849 = vrot.lane.b32.xlu1 %v2748_v23, %s2838_s29 }
0x28e7   :  { %v1850_v40 = vpop.permute.xlu1 %1849 }
0x28e8   :  { %v1852_v24 = vmul.f32 %v2746_v33, %v1850_v40 }
0x28ea   :  { %v1854_v42 = vrot.slane %v1852_v24, 4  ;;  %v1964_v44 = vsel %vm992_vm3, %v1963_v41, %v1852_v24 }
0x28ec   :  { %1855 = vrot.lane.b32.xlu0 %v1854_v42, %s2839_s3 }
0x295e   :  { %v1856_v46 = vpop.permute.xlu0 %1855 }
0x295f   :  { %2484 = vmatmul.mubr.msk.f32.vlgmr.msra.gmra.mrb[16].mxu1 %vm60_vm0, %v1856_v46 }
0x2a32   :  { %v1925_v47 = vpop.f32.mrb[16].mxu1 }
0x2a33   :  { %v1930_v48 = vrot.slane %v1925_v47, 2  ;;  %v2485_v49 = vpop.f32.mrb[17].mxu1 }
0x2a35   :  { %v1932_v50 = vadd.f32 %v1930_v48, %v3148_v21 }
0x2a37   :  { %2749 = vtanh.f32 %v1932_v50  ;;  %v2186_v52 = vmul.f32 -1.442695, %v1932_v50 }
0x2a39   :  { %2751 = vpow2.f32 %v2186_v52 }
0x2a41   :  { %v2750_v51 = vpop.eup %2749 }
0x2a42   :  { %1945 = vrot.lane.b32.xlu1 %v2750_v51, %s2838_s29 }
0x2a43   :  { %v2752_v53 = vpop.eup %2751 }
0x2a44   :  { %v1936_v54 = vadd.f32 1.0, %v2752_v53 }
0x2a46   :  { %2753 = vrcp.f32 %v1936_v54 }
0x2a50   :  { %v2754_v55 = vpop.eup %2753 }
0x2a51   :  { %v1943_v59 = vmul.f32 %v2754_v55, %v1941_v20 }
0x2ab4   :  { %v1946_v56 = vpop.permute.xlu1 %1945 }
0x2ab5   :  { %v1948_v57 = vmul.f32 %v2754_v55, %v1946_v56 }
0x2ab7   :  { %1950 = vrot.lane.b32.xlu0 %v1948_v57, %s2839_s3 }
0x2abb   :  { %1991 = vrot.lane.b32.xlu0 %v3199_v45, %s2839_s3  ;;  %v2609_v45 = vpack.c.bf16 %v1979_v62, %v1978_v43 }
0x2abd   :  { %2610 = vmatprep.subr.bf16.mxu0 %v2609_v45 }
0x2abe   :  { %2612 = vmatpush3.bf16.msra.mxu0 %v2609_v45 }
0x2abf   :  { %2614 = vmatprep.subr.bf16.mxu0 %v2613_v1 }
0x2ac2   :  { %2616 = vmatpush3.bf16.msra.mxu0 %v2613_v1 }
0x2b29   :  { %v1951_v21 = vpop.permute.xlu0 %1950 }
0x2b2a   :  { %v1953_v60 = vadd.f32 %v1951_v21, %v1943_v59 }
0x2b2c   :  { %2755 = vtanh.f32 %v1953_v60 }
0x2b2d   :  { %v1992_v61 = vpop.permute.xlu0 %1991 }
0x2b2e   :  { %2494 = vmatprep.mubr.msk.f32.mxu0 %vm60_vm0, %v1992_v61 }
0x2b36   :  { %v2756_v3 = vpop.eup %2755 }
0x2b37   :  { %1956 = vrot.lane.b32.xlu1 %v2756_v3, %s2838_s29  ;;  %s2117_s29 = sshll.u32 %s2841_s10, 4  ;;  %s2118_s29 = int_to_ptr.vmem [resolvable:$true] %s2117_s29 }
0x2b38   :  { %s2765_s25 = scalar_lea.vmem %s2118_s29, 64  ;;  %p2770_p1 = scmp.lt.s32.totalorder %s2118_s29, %s2118_s29 }
0x2b39   :  { %p2766_p0 = scmp.ne.s32.totalorder %s2118_s29, %s2765_s25  ;;  %p2771_p2 = scmp.lt.s32.totalorder %s2765_s25, %s2765_s25 }
0x2b3b   :  { %p2772_p3 = por %p2771_p2, %p2770_p1 }
0x2b3d   :  { %p2773_p4 = pnand %p2772_p3, %p2766_p0 }
0x2ba9   :  { %v1957_v5 = vpop.permute.xlu1 %1956 }
0x2baa   :  { %v1959_v8 = vmul.f32 %v2754_v55, %v1957_v5 }
0x2bac   :  { %v1965_v7 = vsel %vm994_vm4, %v1964_v44, %v1959_v8 }
0x2bad   :  { %1993 = vrot.lane.b32.xlu1 %v1965_v7, %s2839_s3 }
0x2c1f   :  { %v1994_v9 = vpop.permute.xlu1 %1993 }
0x2c20   :  { %2495 = vmatmul.mubr.msk.f32.vlgmr.msra.gmra.mrb[18].mxu0 %vm60_vm0, %v1994_v9 }
0x2cf3   :  { %v2496_v10 = vpop.f32.mrb[18].mxu0 }
0x2cf4   :  { %v2071_v13 = vadd.f32 %v2496_v10, %v2187_v2  ;;  %v2065_v11 = vpop.f32.mrb[19].mxu0 }
0x2cf5   :  { %v2066_v4 = vadd.f32 %v2187_v2, %v2065_v11 }
0x2cf6   :  { %v2077_v6 = vsel %vm60_vm0, %v2071_v13, -inf }
0x2cf7   :  { %2078 = vmax.xlane.f32.xlu1 %v2077_v6  ;;  %v2074_v12 = vsel %vm60_vm0, %v2066_v4, -inf }
0x2cf8   :  { %2075 = vmax.xlane.f32.xlu0 %v2074_v12 }
0x2d08   :  { %1000 = vrot.lane.b32.xlu1 %v3129_v14, %s2839_s3 }
0x2d0c   :  { %1006 = vrot.lane.b32.xlu1 %v3081_v58, %s2840_s9 }
0x2d10   :  { %1973 = vrot.lane.b32.xlu1 %v1953_v60, %s2840_s9 }
0x2d84   :  { %v2079_v15 = vpop.xlane.xlu1 %2078 }
0x2d85   :  { %v3267_v16 = vsub.f32 %v2071_v13, %v2079_v15  ;;  %v2076_v17 = vpop.xlane.xlu0 %2075 }
0x2d86   :  { %v3269_v18 = vsub.f32 %v2066_v4, %v2076_v17 }
0x2d87   :  { %v2084_v19 = vmul.f32 1.442695, %v3267_v16 }
0x2d88   :  { %v2082_v22 = vmul.f32 1.442695, %v3269_v18  ;;  %v1001_v25 = vpop.permute.xlu1 %1000 }
0x2d89   :  { %2757 = vpow2.f32 %v2084_v19  ;;  %1004 = vst.msk [vmem:[#allocation4 - $0x6] sm:$0xc0] %vm1003_vm5, %v1001_v25 }
0x2d8a   :  { %2759 = vpow2.f32 %v2082_v22 }
0x2d8c   :  { %v1007_v14 = vpop.permute.xlu1 %1006 }
0x2d8d   :  { %1009 = vst.msk [vmem:[#allocation6 - $0x6] sm:$0xc0] %vm1003_vm5, %v1007_v14 }
0x2d90   :  { %v1974_v58 = vpop.permute.xlu1 %1973 }
0x2d91   :  { %1977 = vst.msk [vmem:[#allocation6 - $0x4] sm:$0xc0] %vm1003_vm5, %v1974_v58 }
0x2d93   :  { %v2758_v26 = vpop.eup %2757 }
0x2d94   :  { %v2089_v27 = vsel %vm60_vm0, %v2758_v26, 0.0  ;;  %v2760_v28 = vpop.eup %2759 }
0x2d95   :  { %2090 = vadd.xlane.f32.xlu0 %v2089_v27  ;;  %v2086_v29 = vsel %vm60_vm0, %v2760_v28, 0.0 }
0x2d99   :  { %2087 = vadd.xlane.f32.xlu0 %v2086_v29 }
0x2daf   :  { %1967 = vrot.lane.b32.xlu0 %v1959_v8, %s2839_s3 }
0x2e22   :  { %v2091_v30 = vpop.xlane.xlu0 %2090 }
0x2e23   :  { %2761 = vlog2.f32 %v2091_v30 }
0x2e26   :  { %v2088_v31 = vpop.xlane.xlu0 %2087 }
0x2e27   :  { %2763 = vlog2.f32 %v2088_v31 }
0x2e2a   :  { %v1968_v32 = vpop.permute.xlu0 %1967 }
0x2e2b   :  { %1971 = vst.msk [vmem:[#allocation4 - $0x4] sm:$0xc0] %vm1003_vm5, %v1968_v32 }
0x2e2c   :  { %2776 = shalt.err (!%p2773_p4)
}
0x2e2d   :  { %s2777_s26 = scalar_lea.hbm %s3343_s12, 64 }
0x2e2e   :  { %p2778_p5 = scmp.ne.s32.totalorder %s3343_s12, %s2777_s26  ;;  %p2781_p6 = scmp.lt.u32.totalorder %s2777_s26, %s3343_s12 }
0x2e30   :  { %p2783_p7 = pnand %p2781_p6, %p2778_p5 }
0x2e32   :  { %2786 = shalt.err (!%p2783_p7)
}
0x2e33   :  { %s2843_s7 = smov 2   ;;  %v2762_v33 = vpop.eup %2761  ;;  %s2787_s8 = scalar_lea.vmem %s3279_s24, 64 }
0x2e34   :  { %2123 = dma.vmem_to_hbm [thread:$0]  %s2118_s29, 64, %s3343_s12, [#allocation5], %s2839_s3, %s2839_s3, %s2843_s7  }
0x2e35   :  { %p2788_p8 = scmp.ne.s32.totalorder %s3279_s24, %s2787_s8  ;;  %p2792_p9 = scmp.lt.s32.totalorder %s3279_s24, %s3279_s24 }
0x2e36   :  { %p2793_p10 = scmp.lt.s32.totalorder %s2787_s8, %s2787_s8 }
0x2e38   :  { %p2794_p11 = por %p2793_p10, %p2792_p9 }
0x2e3a   :  { %p2795_p12 = pnand %p2794_p11, %p2788_p8 }
0x2e3c   :  { %2798 = shalt.err (!%p2795_p12)
}
0x2e3d   :  { %s2799_s15 = scalar_lea.hbm %s3344_s13, 64 }
0x2e3e   :  { %p2800_p13 = scmp.ne.s32.totalorder %s3344_s13, %s2799_s15  ;;  %p2803_p0 = scmp.lt.u32.totalorder %s2799_s15, %s3344_s13 }
0x2e40   :  { %p2805_p1 = pnand %p2803_p0, %p2800_p13 }
0x2e42   :  { %2808 = shalt.err (!%p2805_p1)
}
0x2e43   :  { %2135 = dma.vmem_to_hbm [thread:$0]  %s3279_s24, 64, %s3344_s13, [#allocation5], %s2839_s3, %s2839_s3, %s2843_s7   ;;  %v2095_v34 = vmul.f32 0.6931472, %v2762_v33  ;;  %v2764_v36 = vpop.eup %2763 }
0x2e44   :  { %s2844_s21 = smov [#allocation2]   ;;  %v2093_v37 = vmul.f32 0.6931472, %v2764_v36 }
0x2e45   :  { %v2097_v35 = vsub.f32 %v3267_v16, %v2095_v34  ;;  %s2105_s22 = sshll.u32 %s2844_s21, 4  ;;  %s2106_s22 = int_to_ptr.vmem [resolvable:$true] %s2105_s22 }
0x2e46   :  { %v2096_v38 = vsub.f32 %v3269_v18, %v2093_v37  ;;  %s2809_s9 = scalar_lea.vmem %s2106_s22, 256  ;;  %p2814_p3 = scmp.lt.s32.totalorder %s2106_s22, %s2106_s22 }
0x2e47   :  { %2099 = vst.msk [vmem:[#allocation2 + $0x8] sm:$0xff] %vm60_vm0, %v2097_v35  ;;  %p2810_p2 = scmp.ne.s32.totalorder %s2106_s22, %s2809_s9  ;;  %p2815_p4 = scmp.lt.s32.totalorder %s2809_s9, %s2809_s9 }
0x2e48   :  { %2098 = vst.msk [vmem:[#allocation2] sm:$0xff] %vm60_vm0, %v2096_v38 }
0x2e49   :  { %p2816_p5 = por %p2815_p4, %p2814_p3 }
0x2e4b   :  { %p2817_p6 = pnand %p2816_p5, %p2810_p2 }
0x2e4d   :  { %2820 = shalt.err (!%p2817_p6)
}
0x2e4e   :  { %s2821_s10 = scalar_lea.hbm %s3342_s11, 256 }
0x2e4f   :  { %p2822_p7 = scmp.ne.s32.totalorder %s3342_s11, %s2821_s10  ;;  %p2825_p8 = scmp.lt.u32.totalorder %s2821_s10, %s3342_s11 }
0x2e51   :  { %p2827_p9 = pnand %p2825_p8, %p2822_p7 }
0x2e53   :  { %2830 = shalt.err (!%p2827_p9)
}
0x2e54   :  { %s2845_s1 = smov 128   ;;  %s2846_s2 = smov 8  }
0x2e55   :  { %2111 = dma.vmem_to_hbm [thread:$0]  %s2106_s22, 256, %s3342_s11, [#allocation3], %s2845_s1, %s2845_s1, %s2846_s2  }
0x2e56   :  { %2831 = dma.done.wait [#allocation3], 256  }
0x2e57   :  { %2832 = vsyncadd [#allocation3], 4294967040 }
0x2e58   :  { %2833 = dma.done.wait [#allocation5], 128  }
0x2e59   :  { %2834 = vsyncadd [#allocation5], 4294967168 }
0x2e5a   :  { %2145 = vsyncpa [#allocation3], 1 }
0x2e5b   :  { %2146 = vsyncpa [#allocation5], 1 }

</bundles_post_ra>
